<compile_context>
chip_gen: v5e
topology: v5e:2x2
jax: 0.10.0
libtpu: 0.0.40
codegen_flags: <defaults>
</compile_context>

<pallas_src>
import functools

import jax
import jax.numpy as jnp
from jax.experimental import pallas as pl
from jax.experimental.pallas import tpu as pltpu


# ------------------------------ fused kernel -------------------------------


def _vat_kernel(x_ref, d0_ref, w_ref, b_ref,          # inputs  (VMEM)
                lds_ref, xadv_ref, radv_ref,           # outputs (SMEM, VMEM, VMEM)
                *, xi, r_scale, ip, batch):
    x = x_ref[...]          # (B, D) f32
    W = w_ref[...]          # (D, K) f32
    b = b_ref[...]          # (1, K) f32

    # pred = model(x)[0] = x @ W + b  -- computed once, never written to HBM.
    pred = jnp.dot(x, W, preferred_element_type=jnp.float32) + b

    # softmax / log-softmax of pred: computed once, reused by every KL term.
    zl = pred - jnp.max(pred, axis=-1, keepdims=True)
    logp = zl - jnp.log(jnp.sum(jnp.exp(zl), axis=-1, keepdims=True))
    p = jnp.exp(logp)

    def l2_normalize(v):
        # Small epsilon guards an exactly-zero row (the PyTorch reference has
        # none and would produce NaN there).
        ssq = jnp.sum(v * v, axis=-1, keepdims=True)
        return v * jax.lax.rsqrt(ssq + 1e-16)

    # d = _l2_normalize(randn_like(x))
    d = l2_normalize(d0_ref[...])

    # _disable_tracking_bn_stats: no-op (synthetic linear model has no BatchNorm)
    def power_iter(_, dcur):
        # pred_hat = model(x + xi*d)[0] = pred + xi * (d @ W)   (model is linear)
        lh = pred + xi * jnp.dot(dcur, W, preferred_element_type=jnp.float32)
        zh = lh - jnp.max(lh, axis=-1, keepdims=True)
        eh = jnp.exp(zh)
        q = eh / jnp.sum(eh, axis=-1, keepdims=True)
        # d(mean_b KL(p || q)) / d logits_hat  ∝  (q - p); the xi and 1/B factors
        # cancel under the L2 normalization below, so they are dropped.
        g = q - p
        # grad_x = g @ W^T  (contract the class axis; no materialized transpose)
        gx = jax.lax.dot_general(g, W, (((1,), (1,)), ((), ())),
                                 preferred_element_type=jnp.float32)
        return l2_normalize(gx)          # d = _l2_normalize(d.grad)

    d = jax.lax.fori_loop(0, ip, power_iter, d, unroll=True)

    # r_adv = d * eps * prop_eps (scalar eps branch); outputs are lane-dense.
    r_adv = d * r_scale
    radv_ref[...] = r_adv
    xadv_ref[...] = x + r_adv

    # lds = KL_div(model(x + r_adv)[0], pred) with batch-mean reduction.
    # TODO(synk): KL_div class is not given; assumed standard VAT KL with
    # reduce=True (batch mean).
    lh = pred + r_scale * jnp.dot(d, W, preferred_element_type=jnp.float32)
    zh = lh - jnp.max(lh, axis=-1, keepdims=True)
    logq = zh - jnp.log(jnp.sum(jnp.exp(zh), axis=-1, keepdims=True))
    lds_ref[0, 0] = jnp.sum(p * (logp - logq)) * (1.0 / batch)


# -------------------------------- wrapper ----------------------------------


def vat_loss(x, W, b, key, xi=1e-6, eps=8.0, prop_eps=1.0, ip=1):
    """Forward pass of VATLoss. Returns (lds, x + r_adv, r_adv)."""
    B = x.shape[0]
    x2d = x.reshape(B, -1).astype(jnp.float32)
    D = x2d.shape[1]
    K = W.shape[1]

    d0 = jax.random.normal(key, (B, D), dtype=jnp.float32)
    r_scale = float(eps) * float(prop_eps)

    kern = functools.partial(_vat_kernel, xi=float(xi), r_scale=r_scale,
                             ip=int(ip), batch=float(B))

    vmem = pl.BlockSpec(memory_space=pltpu.MemorySpace.VMEM)
    smem = pl.BlockSpec(memory_space=pltpu.MemorySpace.SMEM)

    lds11, x_adv2d, r_adv2d = pl.pallas_call(
        kern,
        in_specs=[vmem, vmem, vmem, vmem],
        out_specs=(smem, vmem, vmem),
        out_shape=(
            jax.ShapeDtypeStruct((1, 1), jnp.float32),   # lds (scalar, SMEM)
            jax.ShapeDtypeStruct((B, D), jnp.float32),   # x + r_adv
            jax.ShapeDtypeStruct((B, D), jnp.float32),   # r_adv
        ),
    )(x2d, d0, W.astype(jnp.float32), b.reshape(1, K).astype(jnp.float32))

    lds = lds11[0, 0]
    return lds, x_adv2d.reshape(x.shape), r_adv2d.reshape(x.shape)


# ---------------------------------- main -----------------------------------

if __name__ == "__main__":
    key = jax.random.PRNGKey(0)
    kx, kw, kd = jax.random.split(key, 3)

    B, C, H, Wsp = 2, 4, 16, 16
    D = C * H * Wsp
    K = 32  # classes emitted by the synthetic linear "model"

    x = jax.random.normal(kx, (B, C, H, Wsp), dtype=jnp.float32)
    W = jax.random.normal(kw, (D, K), dtype=jnp.float32) * 0.02
    b = jnp.zeros((K,), dtype=jnp.float32)

    # xi is a hyperparameter; 1e-2 keeps the perturbation above f32 rounding
    # (deliberate deviation from the module's 1e-6 default, which underflows in
    # f32 exactly as PyTorch f32 would).
    lds, x_adv, r_adv = vat_loss(x, W, b, kd, xi=1e-2, eps=8.0, prop_eps=1.0, ip=1)

    jax.block_until_ready((lds, x_adv, r_adv))
    assert x_adv.shape == x.shape and r_adv.shape == x.shape and lds.shape == ()
    print("KERNEL_OK")
</pallas_src>

<mosaic_0001>
module attributes {stable_mosaic.version = 11 : i64} {
  func.func @_vat_kernel(%arg0: memref<2x1024xf32, #tpu.memory_space<vmem>>, %arg1: memref<2x1024xf32, #tpu.memory_space<vmem>>, %arg2: memref<1024x32xf32, #tpu.memory_space<vmem>>, %arg3: memref<1x32xf32, #tpu.memory_space<vmem>>, %arg4: memref<1x1xf32, #tpu.memory_space<smem>>, %arg5: memref<2x1024xf32, #tpu.memory_space<vmem>>, %arg6: memref<2x1024xf32, #tpu.memory_space<vmem>>) attributes {dimension_semantics = [], scalar_prefetch = 0 : i64, scratch_operands = 0 : i64, tpu.core_type = #tpu.core_type<tc>} {
    %c0 = arith.constant 0 : index
    %c0_0 = arith.constant 0 : index
    %0 = vector.load %arg0[%c0, %c0_0] : memref<2x1024xf32, #tpu.memory_space<vmem>>, vector<2x1024xf32>
    %c0_1 = arith.constant 0 : index
    %c0_2 = arith.constant 0 : index
    %1 = vector.load %arg2[%c0_1, %c0_2] : memref<1024x32xf32, #tpu.memory_space<vmem>>, vector<1024x32xf32>
    %c0_3 = arith.constant 0 : index
    %c0_4 = arith.constant 0 : index
    %2 = vector.load %arg3[%c0_3, %c0_4] : memref<1x32xf32, #tpu.memory_space<vmem>>, vector<1x32xf32>
    %cst = arith.constant dense<0.000000e+00> : vector<2x32xf32>
    %3 = tpu.matmul %0, %1, %cst {dimension_numbers = #tpu.dot_dimension_numbers<[1], [0], [0], [1], [0, 0, 1, 1], [], []>} : vector<2x1024xf32>, vector<1024x32xf32>, vector<2x32xf32> -> vector<2x32xf32>
    %4 = vector.broadcast %2 : vector<1x32xf32> to vector<2x32xf32>
    %5 = arith.addf %3, %4 : vector<2x32xf32>
    %cst_5 = arith.constant dense<0xFF800000> : vector<2xf32>
    %6 = vector.multi_reduction <maximumf>, %5, %cst_5 [1] : vector<2x32xf32> to vector<2xf32>
    %7 = vector.shape_cast %6 : vector<2xf32> to vector<2x1xf32>
    %8 = vector.broadcast %7 : vector<2x1xf32> to vector<2x32xf32>
    %9 = arith.subf %5, %8 : vector<2x32xf32>
    %10 = math.exp %9 : vector<2x32xf32>
    %cst_6 = arith.constant dense<0.000000e+00> : vector<2xf32>
    %11 = vector.multi_reduction <add>, %10, %cst_6 [1] : vector<2x32xf32> to vector<2xf32>
    %12 = vector.shape_cast %11 : vector<2xf32> to vector<2x1xf32>
    %13 = math.log %12 : vector<2x1xf32>
    %14 = vector.broadcast %13 : vector<2x1xf32> to vector<2x32xf32>
    %15 = arith.subf %9, %14 : vector<2x32xf32>
    %16 = math.exp %15 : vector<2x32xf32>
    %c0_7 = arith.constant 0 : index
    %c0_8 = arith.constant 0 : index
    %17 = vector.load %arg1[%c0_7, %c0_8] : memref<2x1024xf32, #tpu.memory_space<vmem>>, vector<2x1024xf32>
    %18 = arith.mulf %17, %17 : vector<2x1024xf32>
    %cst_9 = arith.constant dense<0.000000e+00> : vector<2xf32>
    %19 = vector.multi_reduction <add>, %18, %cst_9 [1] : vector<2x1024xf32> to vector<2xf32>
    %20 = vector.shape_cast %19 : vector<2xf32> to vector<2x1xf32>
    %cst_10 = arith.constant 1.000000e-16 : f32
    %21 = vector.broadcast %cst_10 : f32 to vector<2x1xf32>
    %22 = arith.addf %20, %21 : vector<2x1xf32>
    %23 = math.rsqrt %22 : vector<2x1xf32>
    %24 = vector.broadcast %23 : vector<2x1xf32> to vector<2x1024xf32>
    %25 = arith.mulf %17, %24 : vector<2x1024xf32>
    %c0_i32 = arith.constant 0 : i32
    %cst_11 = arith.constant dense<0.000000e+00> : vector<2x32xf32>
    %26 = tpu.matmul %25, %1, %cst_11 {dimension_numbers = #tpu.dot_dimension_numbers<[1], [0], [0], [1], [0, 0, 1, 1], [], []>} : vector<2x1024xf32>, vector<1024x32xf32>, vector<2x32xf32> -> vector<2x32xf32>
    %cst_12 = arith.constant 0.00999999977 : f32
    %27 = vector.broadcast %cst_12 : f32 to vector<2x32xf32>
    %28 = arith.mulf %27, %26 : vector<2x32xf32>
    %29 = arith.addf %5, %28 : vector<2x32xf32>
    %cst_13 = arith.constant dense<0xFF800000> : vector<2xf32>
    %30 = vector.multi_reduction <maximumf>, %29, %cst_13 [1] : vector<2x32xf32> to vector<2xf32>
    %31 = vector.shape_cast %30 : vector<2xf32> to vector<2x1xf32>
    %32 = vector.broadcast %31 : vector<2x1xf32> to vector<2x32xf32>
    %33 = arith.subf %29, %32 : vector<2x32xf32>
    %34 = math.exp %33 : vector<2x32xf32>
    %cst_14 = arith.constant dense<0.000000e+00> : vector<2xf32>
    %35 = vector.multi_reduction <add>, %34, %cst_14 [1] : vector<2x32xf32> to vector<2xf32>
    %36 = vector.shape_cast %35 : vector<2xf32> to vector<2x1xf32>
    %37 = vector.broadcast %36 : vector<2x1xf32> to vector<2x32xf32>
    %38 = arith.divf %34, %37 : vector<2x32xf32>
    %39 = arith.subf %38, %16 : vector<2x32xf32>
    %cst_15 = arith.constant dense<0.000000e+00> : vector<2x1024xf32>
    %40 = tpu.matmul %39, %1, %cst_15 {dimension_numbers = #tpu.dot_dimension_numbers<[1], [1], [0], [0], [0, 0, 1, 0], [], []>} : vector<2x32xf32>, vector<1024x32xf32>, vector<2x1024xf32> -> vector<2x1024xf32>
    %41 = arith.mulf %40, %40 : vector<2x1024xf32>
    %cst_16 = arith.constant dense<0.000000e+00> : vector<2xf32>
    %42 = vector.multi_reduction <add>, %41, %cst_16 [1] : vector<2x1024xf32> to vector<2xf32>
    %43 = vector.shape_cast %42 : vector<2xf32> to vector<2x1xf32>
    %cst_17 = arith.constant 1.000000e-16 : f32
    %44 = vector.broadcast %cst_17 : f32 to vector<2x1xf32>
    %45 = arith.addf %43, %44 : vector<2x1xf32>
    %46 = math.rsqrt %45 : vector<2x1xf32>
    %47 = vector.broadcast %46 : vector<2x1xf32> to vector<2x1024xf32>
    %48 = arith.mulf %40, %47 : vector<2x1024xf32>
    %cst_18 = arith.constant 8.000000e+00 : f32
    %49 = vector.broadcast %cst_18 : f32 to vector<2x1024xf32>
    %50 = arith.mulf %48, %49 : vector<2x1024xf32>
    %c0_19 = arith.constant 0 : index
    %c0_20 = arith.constant 0 : index
    %51 = vector.load %arg6[%c0_19, %c0_20] : memref<2x1024xf32, #tpu.memory_space<vmem>>, vector<2x1024xf32>
    tpu.vector_store %arg6[%c0_19, %c0_20], %50 {strides = array<i32>} : memref<2x1024xf32, #tpu.memory_space<vmem>>, vector<2x1024xf32>,
    %52 = arith.addf %0, %50 : vector<2x1024xf32>
    %c0_21 = arith.constant 0 : index
    %c0_22 = arith.constant 0 : index
    %53 = vector.load %arg5[%c0_21, %c0_22] : memref<2x1024xf32, #tpu.memory_space<vmem>>, vector<2x1024xf32>
    tpu.vector_store %arg5[%c0_21, %c0_22], %52 {strides = array<i32>} : memref<2x1024xf32, #tpu.memory_space<vmem>>, vector<2x1024xf32>,
    %cst_23 = arith.constant dense<0.000000e+00> : vector<2x32xf32>
    %54 = tpu.matmul %48, %1, %cst_23 {dimension_numbers = #tpu.dot_dimension_numbers<[1], [0], [0], [1], [0, 0, 1, 1], [], []>} : vector<2x1024xf32>, vector<1024x32xf32>, vector<2x32xf32> -> vector<2x32xf32>
    %cst_24 = arith.constant 8.000000e+00 : f32
    %55 = vector.broadcast %cst_24 : f32 to vector<2x32xf32>
    %56 = arith.mulf %55, %54 : vector<2x32xf32>
    %57 = arith.addf %5, %56 : vector<2x32xf32>
    %cst_25 = arith.constant dense<0xFF800000> : vector<2xf32>
    %58 = vector.multi_reduction <maximumf>, %57, %cst_25 [1] : vector<2x32xf32> to vector<2xf32>
    %59 = vector.shape_cast %58 : vector<2xf32> to vector<2x1xf32>
    %60 = vector.broadcast %59 : vector<2x1xf32> to vector<2x32xf32>
    %61 = arith.subf %57, %60 : vector<2x32xf32>
    %62 = math.exp %61 : vector<2x32xf32>
    %cst_26 = arith.constant dense<0.000000e+00> : vector<2xf32>
    %63 = vector.multi_reduction <add>, %62, %cst_26 [1] : vector<2x32xf32> to vector<2xf32>
    %64 = vector.shape_cast %63 : vector<2xf32> to vector<2x1xf32>
    %65 = math.log %64 : vector<2x1xf32>
    %66 = vector.broadcast %65 : vector<2x1xf32> to vector<2x32xf32>
    %67 = arith.subf %61, %66 : vector<2x32xf32>
    %68 = arith.subf %15, %67 : vector<2x32xf32>
    %69 = arith.mulf %16, %68 : vector<2x32xf32>
    %70 = vector.shape_cast %69 : vector<2x32xf32> to vector<1x2x32xf32>
    %cst_27 = arith.constant dense<0.000000e+00> : vector<1xf32>
    %71 = vector.multi_reduction <add>, %70, %cst_27 [1, 2] : vector<1x2x32xf32> to vector<1xf32>
    %72 = vector.shape_cast %71 : vector<1xf32> to vector<1x1x1xf32>
    %73 = vector.extract %72[0, 0, 0] : f32 from vector<1x1x1xf32>
    %cst_28 = arith.constant 5.000000e-01 : f32
    %74 = arith.mulf %73, %cst_28 : f32
    %c0_29 = arith.constant 0 : index
    %c0_30 = arith.constant 0 : index
    %75 = memref.load %arg4[%c0_29, %c0_30] : memref<1x1xf32, #tpu.memory_space<smem>>
    memref.store %74, %arg4[%c0_29, %c0_30] : memref<1x1xf32, #tpu.memory_space<smem>>
    return
  }
}

</mosaic_0001>

<bundles_post_ra>
// kernel: tpu_custom_call.1
= control target key start
LH: loop header
LB: loop body
LE: loop exit
PB: predicated region body
PF: predicated region fallthrough
CT: control target
= control target key end

     0   :  { %12 = vsyncpa [#allocation4], 0  ;;  %s3596_s0 = inlined_call_operand.vmem [shape: f32[2,1024], index: 0, kind: input, shape index: {}]   ;;  %s3597_s1 = inlined_call_operand.vmem [shape: f32[2,1024], index: 1, kind: input, shape index: {}]   ;;  %s3598_s2 = inlined_call_operand.vmem [shape: f32[1024,32], index: 2, kind: input, shape index: {}]   ;;  %s3599_s3 = inlined_call_operand.vmem [shape: f32[1,32], index: 3, kind: input, shape index: {}]   ;;  %s3600_s4 = inlined_call_operand.hbm [shape: f32[1,1], index: 4, kind: output, shape index: {0}]   ;;  %s3601_s5 = inlined_call_operand.hbm [shape: f32[2,1024], index: 5, kind: output, shape index: {1}]   ;;  %s3602_s6 = inlined_call_operand.hbm [shape: f32[2,1024], index: 6, kind: output, shape index: {2}]  }
   0x1   :  { %13 = vsyncpa [#allocation3], 0  ;;  %v1886_v0 = vld [vmem:[%s3598_s2 + $0x178] sm:$0xff]  ;;  %v1896_v2 = vld [vmem:[%s3598_s2 + $0x170] sm:$0xff] }
   0x2   :  { %v1891_v1 = vld [vmem:[%s3598_s2 + $0x78] sm:$0xff]  ;;  %218 = vmatpush.msra.mxu2 %v1886_v0  ;;  %v1908_v4 = vld [vmem:[%s3598_s2 + $0x70] sm:$0xff]  ;;  %v1920_v6 = vld [vmem:[%s3598_s2 + $0x168] sm:$0xff] }
   0x3   :  { %178 = vmatpush.msra.mxu0 %v1891_v1  ;;  %v1903_v3 = vld [vmem:[%s3598_s2 + $0x1f8] sm:$0xff]  ;;  %v1925_v7 = vld [vmem:[%s3598_s2 + $0x1f0] sm:$0xff]  ;;  %v1930_v8 = vld [vmem:[%s3598_s2 + $0x68] sm:$0xff] }
   0x4   :  { %v1913_v5 = vld [vmem:[%s3598_s2 + $0xf8] sm:$0xff]  ;;  %238 = vmatpush.msra.mxu3 %v1903_v3  ;;  %219 = vmatpush.msra.mxu2 %v1896_v2  ;;  %v1937_v9 = vld [vmem:[%s3598_s2 + $0xf0] sm:$0xff]  ;;  %v1942_v10 = vld [vmem:[%s3598_s2 + $0x1e8] sm:$0xff] }
   0x5   :  { %198 = vmatpush.msra.mxu1 %v1913_v5  ;;  %179 = vmatpush.msra.mxu0 %v1908_v4  ;;  %v1949_v11 = vld [vmem:[%s3598_s2 + $0x160] sm:$0xff]  ;;  %v1959_v13 = vld [vmem:[%s3598_s2 + $0xe8] sm:$0xff]  ;;  %v1978_v16 = vld [vmem:[%s3598_s2 + $0x158] sm:$0xff] }
   0x6   :  { %239 = vmatpush.msra.mxu3 %v1925_v7  ;;  %v1954_v12 = vld [vmem:[%s3598_s2 + $0x60] sm:$0xff]  ;;  %220 = vmatpush.msra.mxu2 %v1920_v6  ;;  %v1983_v17 = vld [vmem:[%s3598_s2 + $0x58] sm:$0xff]  ;;  %v2002_v20 = vld [vmem:[%s3598_s2 + $0x150] sm:$0xff] }
   0x7   :  { %199 = vmatpush.msra.mxu1 %v1937_v9  ;;  %180 = vmatpush.msra.mxu0 %v1930_v8  ;;  %v1966_v14 = vld [vmem:[%s3598_s2 + $0x1e0] sm:$0xff]  ;;  %v1990_v18 = vld [vmem:[%s3598_s2 + $0x1d8] sm:$0xff]  ;;  %v2007_v21 = vld [vmem:[%s3598_s2 + $0x50] sm:$0xff] }
   0x8   :  { %v1971_v15 = vld [vmem:[%s3598_s2 + $0xe0] sm:$0xff]  ;;  %240 = vmatpush.msra.mxu3 %v1942_v10  ;;  %221 = vmatpush.msra.mxu2 %v1949_v11  ;;  %v1995_v19 = vld [vmem:[%s3598_s2 + $0xd8] sm:$0xff]  ;;  %v2014_v22 = vld [vmem:[%s3598_s2 + $0x1d0] sm:$0xff] }
   0x9   :  { %200 = vmatpush.msra.mxu1 %v1959_v13  ;;  %181 = vmatpush.msra.mxu0 %v1954_v12  ;;  %v2019_v23 = vld [vmem:[%s3598_s2 + $0xd0] sm:$0xff]  ;;  %v2026_v24 = vld [vmem:[%s3598_s2 + $0x148] sm:$0xff]  ;;  %v2050_v28 = vld [vmem:[%s3598_s2 + $0x140] sm:$0xff] }
   0xa   :  { %241 = vmatpush.msra.mxu3 %v1966_v14  ;;  %222 = vmatpush.msra.mxu2 %v1978_v16  ;;  %v2031_v25 = vld [vmem:[%s3598_s2 + $0x48] sm:$0xff]  ;;  %v2055_v29 = vld [vmem:[%s3598_s2 + $0x40] sm:$0xff]  ;;  %v2074_v32 = vld [vmem:[%s3598_s2 + $0x138] sm:$0xff] }
   0xb   :  { %201 = vmatpush.msra.mxu1 %v1971_v15  ;;  %182 = vmatpush.msra.mxu0 %v1983_v17  ;;  %v2038_v26 = vld [vmem:[%s3598_s2 + $0x1c8] sm:$0xff]  ;;  %v2062_v30 = vld [vmem:[%s3598_s2 + $0x1c0] sm:$0xff]  ;;  %v2079_v33 = vld [vmem:[%s3598_s2 + $0x38] sm:$0xff] }
   0xc   :  { %242 = vmatpush.msra.mxu3 %v1990_v18  ;;  %223 = vmatpush.msra.mxu2 %v2002_v20  ;;  %v2043_v27 = vld [vmem:[%s3598_s2 + $0xc8] sm:$0xff]  ;;  %v2067_v31 = vld [vmem:[%s3598_s2 + $0xc0] sm:$0xff]  ;;  %v2086_v34 = vld [vmem:[%s3598_s2 + $0x1b8] sm:$0xff] }
   0xd   :  { %202 = vmatpush.msra.mxu1 %v1995_v19  ;;  %183 = vmatpush.msra.mxu0 %v2007_v21  ;;  %v2091_v35 = vld [vmem:[%s3598_s2 + $0xb8] sm:$0xff]  ;;  %v2098_v36 = vld [vmem:[%s3598_s2 + $0x130] sm:$0xff]  ;;  %v2122_v40 = vld [vmem:[%s3598_s2 + $0x128] sm:$0xff] }
   0xe   :  { %243 = vmatpush.msra.mxu3 %v2014_v22  ;;  %224 = vmatpush.msra.mxu2 %v2026_v24  ;;  %v2103_v37 = vld [vmem:[%s3598_s2 + $0x30] sm:$0xff]  ;;  %3762 = vst [vmem:[#allocation11_spill] sm:$0xff] %v2122_v40  ;;  %v2127_v41 = vld [vmem:[%s3598_s2 + $0x28] sm:$0xff]  ;;  %v2134_v42 = vld [vmem:[%s3598_s2 + $0x120] sm:$0xff] }
   0xf   :  { %203 = vmatpush.msra.mxu1 %v2019_v23  ;;  %184 = vmatpush.msra.mxu0 %v2031_v25  ;;  %v2110_v38 = vld [vmem:[%s3598_s2 + $0x1b0] sm:$0xff]  ;;  %3763 = vst [vmem:[#allocation12_spill] sm:$0xff] %v2134_v42  ;;  %v2139_v43 = vld [vmem:[%s3598_s2 + $0x1a8] sm:$0xff]  ;;  %v2151_v45 = vld [vmem:[%s3598_s2 + $0x20] sm:$0xff] }
  0x10   :  { %244 = vmatpush.msra.mxu3 %v2038_v26  ;;  %225 = vmatpush.msra.mxu2 %v2050_v28  ;;  %v2115_v39 = vld [vmem:[%s3598_s2 + $0xb0] sm:$0xff]  ;;  %3764 = vst [vmem:[#allocation13_spill] sm:$0xff] %v2139_v43  ;;  %v2144_v44 = vld [vmem:[%s3598_s2 + $0xa8] sm:$0xff]  ;;  %v2156_v46 = vld [vmem:[%s3596_s0] sm:$0xff] }
  0x11   :  { %204 = vmatpush.msra.mxu1 %v2043_v27  ;;  %185 = vmatpush.msra.mxu0 %v2055_v29  ;;  %3765 = vst [vmem:[#allocation14_spill] sm:$0xff] %v2144_v44  ;;  %v2161_v47 = vld [vmem:[%s3596_s0 + $0x8] sm:$0xff]  ;;  %v2168_v48 = vld [vmem:[%s3598_s2 + $0x1a0] sm:$0xff]  ;;  %v2181_v50 = vld [vmem:[%s3598_s2 + $0x118] sm:$0xff] }
  0x12   :  { %245 = vmatpush.msra.mxu3 %v2062_v30  ;;  %226 = vmatpush.msra.mxu2 %v2074_v32  ;;  %3766 = vst [vmem:[#allocation15_spill] sm:$0xff] %v2151_v45  ;;  %v2173_v49 = vld [vmem:[%s3598_s2 + $0xa0] sm:$0xff]  ;;  %v2186_v51 = vld [vmem:[%s3598_s2 + $0x18] sm:$0xff] }
  0x13   :  { %205 = vmatpush.msra.mxu1 %v2067_v31  ;;  %186 = vmatpush.msra.mxu0 %v2079_v33  ;;  %3767 = vst [vmem:[#allocation16_spill] sm:$0xff] %v2156_v46 }
  0x14   :  { %246 = vmatpush.msra.mxu3 %v2086_v34  ;;  %227 = vmatpush.msra.mxu2 %v2098_v36  ;;  %3768 = vst [vmem:[#allocation17_spill] sm:$0xff] %v2161_v47 }
  0x15   :  { %206 = vmatpush.msra.mxu1 %v2091_v35  ;;  %187 = vmatpush.msra.mxu0 %v2103_v37  ;;  %3769 = vst [vmem:[#allocation18_spill] sm:$0xff] %v2168_v48 }
  0x16   :  { %247 = vmatpush.msra.mxu3 %v2110_v38  ;;  %228 = vmatpush.msra.mxu2 %v2122_v40  ;;  %3770 = vst [vmem:[#allocation19_spill] sm:$0xff] %v2173_v49 }
  0x17   :  { %207 = vmatpush.msra.mxu1 %v2115_v39  ;;  %188 = vmatpush.msra.mxu0 %v2127_v41  ;;  %159 = vst [vmem:[#allocation1] ss:$4 sm:$0xff] %v2156_v46 }
  0x18   :  { %248 = vmatpush.msra.mxu3 %v2139_v43  ;;  %3771 = vst [vmem:[#allocation20_spill] sm:$0xff] %v2181_v50 }
  0x19   :  { %208 = vmatpush.msra.mxu1 %v2144_v44  ;;  %3772 = vst [vmem:[#allocation21_spill] sm:$0xff] %v2186_v51 }
  0x1a   :  { %161 = vst [vmem:[#allocation1 + $0x20] ss:$4 sm:$0xff] %v2161_v47 }
  0x1b   :  { %14 = vsyncpa [#allocation7], 0  ;;  %229 = vmatpush.msra.mxu2 %v2134_v42  ;;  %189 = vmatpush.msra.mxu0 %v2151_v45  ;;  %v2194_v52 = vld [vmem:[%s3598_s2 + $0x110] sm:$0xff]  ;;  %v2199_v53 = vld [vmem:[%s3598_s2 + $0x198] sm:$0xff]  ;;  %vm378_vm0 = vcmask 1041408   ;;  %vm338_vm4 = vcmask 254976  }
  0x1c   :  { %3773 = vst [vmem:[#allocation22_spill] sm:$0xff] %v2194_v52  ;;  %v2204_v54 = vld [vmem:[%s3598_s2 + $0x98] sm:$0xff]  ;;  %249 = vmatpush.msra.mxu3 %v2168_v48  ;;  %209 = vmatpush.msra.mxu1 %v2173_v49  ;;  %v2211_v55 = vld [vmem:[%s3598_s2 + $0x10] sm:$0xff]  ;;  %v2216_v56 = vld [vmem:[%s3598_s2 + $0x108] sm:$0xff]  ;;  %vm623_vm5 = vcmask 261120   ;;  %vm1238_vm13 = vcmask 1045508  }
  0x1d   :  { %3774 = vst [vmem:[#allocation23_spill] sm:$0xff] %v2199_v53  ;;  %v2221_v57 = vld [vmem:[%s3598_s2 + $0x190] sm:$0xff]  ;;  %230 = vmatpush.msra.mxu2 %v2181_v50  ;;  %190 = vmatpush.msra.mxu0 %v2186_v51  ;;  %v2228_v58 = vld [vmem:[%s3598_s2 + $0x8] sm:$0xff]  ;;  %v2238_v60 = vld [vmem:[%s3597_s1] sm:$0xff]  ;;  %vm1240_vm14 = vcmask 1043456   ;;  %s1458_s0 = sshll.u32 %s3601_s5, 4  ;;  %s1459_s0 = int_to_ptr.hbm [resolvable:$true] %s1458_s0 }
  0x1e   :  { %3775 = vst [vmem:[#allocation24_spill] sm:$0xff] %v2204_v54  ;;  %v2233_v59 = vld [vmem:[%s3598_s2 + $0x90] sm:$0xff]  ;;  %250 = vmatpush.msra.mxu3 %v2199_v53  ;;  %210 = vmatpush.msra.mxu1 %v2204_v54  ;;  %v2245_v61 = vld [vmem:[%s3598_s2 + $0x100] sm:$0xff]  ;;  %v2250_v62 = vld [vmem:[%s3598_s2 + $0x188] sm:$0xff]  ;;  %v355_v54 = vmul.f32 %v2238_v60, %v2238_v60  ;;  %s1846_s25 = smov [#allocation6]   ;;  %s1469_s29 = sshll.u32 %s3602_s6, 4  ;;  %s1470_s29 = int_to_ptr.hbm [resolvable:$true] %s1469_s29 }
  0x1f   :  { %3776 = vst [vmem:[#allocation25_spill] sm:$0xff] %v2211_v55  ;;  %v2255_v63 = vld [vmem:[%s3597_s1 + $0x8] sm:$0xff]  ;;  %231 = vmatpush.msra.mxu2 %v2194_v52  ;;  %191 = vmatpush.msra.mxu0 %v2211_v55  ;;  %v2262_v47 = vld [vmem:[%s3598_s2 + $0x378] sm:$0xff]  ;;  %v2267_v46 = vld [vmem:[%s3598_s2] sm:$0xff]  ;;  %s1467_s26 = sshll.u32 %s1846_s25, 4  ;;  %s1447_s7 = sshll.u32 %s3600_s4, 4  ;;  %s1468_s26 = int_to_ptr.vmem [resolvable:$true] %s1467_s26  ;;  %s1448_s7 = int_to_ptr.hbm [resolvable:$true] %s1447_s7 }
  0x20   :  { %3777 = vst [vmem:[#allocation26_spill] sm:$0xff] %v2216_v56  ;;  %v2272_v53 = vld [vmem:[%s3598_s2 + $0x88] sm:$0xff]  ;;  %v2277_v52 = vld [vmem:[%s3598_s2 + $0x180] sm:$0xff]  ;;  %251 = vmatpush.msra.mxu3 %v2221_v57  ;;  %211 = vmatpush.msra.mxu1 %v2233_v59  ;;  %v2290_v51 = vld [vmem:[%s3598_s2 + $0x278] sm:$0xff]  ;;  %s1847_s9 = smov [#allocation2]  }
  0x21   :  { %3778 = vst [vmem:[#allocation27_spill] sm:$0xff] %v2221_v57  ;;  %v2281_v55 = vld.sshfl [vmem:[#allocation1] sm:$0xff pattern:$0x73625140]  ;;  %v2295_v48 = vld [vmem:[%s3598_s2 + $0x3f8] sm:$0xff]  ;;  %232 = vmatpush.msra.mxu2 %v2216_v56  ;;  %192 = vmatpush.msra.mxu0 %v2228_v58  ;;  %v2308_v42 = vld [vmem:[%s3598_s2 + $0x370] sm:$0xff] }
  0x22   :  { %3779 = vst [vmem:[#allocation28_spill] sm:$0xff] %v2228_v58  ;;  %v2283_v50 = vld.sshfl [vmem:[#allocation1 + $0x8] sm:$0xff pattern:$0x73625140]  ;;  %252 = vmatpush.msra.mxu3 %v2250_v62  ;;  %212 = vmatpush.msra.mxu1 %v2272_v53 }
  0x23   :  { %3780 = vst [vmem:[#allocation29_spill] sm:$0xff] %v2233_v59  ;;  %v2299_v57 = vld.sshfl [vmem:[#allocation1 + $0x10] sm:$0xff pattern:$0x73625140]  ;;  %233 = vmatpush.msra.mxu2 %v2245_v61  ;;  %193 = vmatpush.msra.mxu0 %v2267_v46 }
  0x24   :  { %3781 = vst [vmem:[#allocation30_spill] sm:$0xff] %v2238_v60  ;;  %v2301_v59 = vld.sshfl [vmem:[#allocation1 + $0x18] sm:$0xff pattern:$0x73625140]  ;;  %v356_v60 = vmul.f32 %v2255_v63, %v2255_v63  ;;  %253 = vmatpush.msra.mxu3 %v2277_v52  ;;  %234 = vmatmul.f32.vlgmr.msra.gmra.mxu2 %v2299_v57  ;;  %v2620_v57 = vld [vmem:[%s3598_s2 + $0x310] sm:$0xff] }
  0x25   :  { %3782 = vst [vmem:[#allocation31_spill] sm:$0xff] %v2245_v61  ;;  %v2311_v49 = vld.sshfl [vmem:[#allocation1 + $0x20] sm:$0xff pattern:$0x73625140]  ;;  %298 = vmatpush.msrb.mxu2 %v2262_v47  ;;  %v2332_v61 = vld [vmem:[%s3598_s2 + $0x270] sm:$0xff]  ;;  %258 = vmatpush.msrb.mxu0 %v2290_v51 }
  0x26   :  { %3783 = vst [vmem:[#allocation32_spill] sm:$0xff] %v2250_v62  ;;  %v2313_v45 = vld.sshfl [vmem:[#allocation1 + $0x28] sm:$0xff pattern:$0x73625140]  ;;  %v2337_v62 = vld [vmem:[%s3598_s2 + $0x2f8] sm:$0xff]  ;;  %318 = vmatpush.msrb.mxu3 %v2295_v48  ;;  %194 = vmatmul.f32.vlgmr.msra.gmra.mxu0 %v2281_v55 }
  0x27   :  { %3784 = vst [vmem:[#allocation33_spill] sm:$0xff] %v2255_v63  ;;  %v2317_v56 = vld.sshfl [vmem:[#allocation1 + $0x30] sm:$0xff pattern:$0x73625140]  ;;  %v2327_v63 = vld [vmem:[%s3598_s2 + $0x80] sm:$0xff]  ;;  %299 = vmatpush.msrb.mxu2 %v2308_v42  ;;  %259 = vmatpush.msrb.mxu0 %v2332_v61  ;;  %v2638_v55 = vld [vmem:[%s3598_s2 + $0x298] sm:$0xff] }
  0x28   :  { %3785 = vst [vmem:[#allocation34_spill] sm:$0xff] %v2262_v47  ;;  %v2319_v58 = vld.sshfl [vmem:[#allocation1 + $0x38] sm:$0xff pattern:$0x73625140]  ;;  %v2349_v47 = vld [vmem:[%s3598_s2 + $0x3f0] sm:$0xff]  ;;  %213 = vmatpush.msra.mxu1 %v2327_v63  ;;  %254 = vmatmul.f32.vlgmr.msra.gmra.mxu3 %v2301_v59 }
  0x29   :  { %3786 = vst [vmem:[#allocation35_spill] sm:$0xff] %v2267_v46  ;;  %319 = vmatpush.msrb.mxu3 %v2349_v47  ;;  %v2650_v59 = vld [vmem:[%s3598_s2 + $0x390] sm:$0xff]  ;;  %214 = vmatmul.f32.vlgmr.msra.gmra.mxu1 %v2283_v50  ;;  %v2674_v50 = vld [vmem:[%s3598_s2 + $0x388] sm:$0xff] }
  0x2a   :  { %3787 = vst [vmem:[#allocation36_spill] sm:$0xff] %v2272_v53  ;;  %278 = vmatpush.msrb.mxu1 %v2337_v62 }
  0x2b   :  { %3788 = vst [vmem:[#allocation37_spill] sm:$0xff] %v2277_v52  ;;  %v2402_v52 = vld [vmem:[%s3598_s2 + $0x258] sm:$0xff] }
  0x2c   :  { %3789 = vst [vmem:[#allocation38_spill] sm:$0xff] %v2290_v51  ;;  %v2373_v51 = vld [vmem:[%s3598_s2 + $0x3e8] sm:$0xff] }
  0x2d   :  { %3790 = vst [vmem:[#allocation39_spill] sm:$0xff] %v2295_v48  ;;  %v2361_v48 = vld [vmem:[%s3598_s2 + $0x2f0] sm:$0xff]  ;;  %320 = vmatpush.msrb.mxu3 %v2373_v51 }
  0x2e   :  { %3791 = vst [vmem:[#allocation40_spill] sm:$0xff] %v2308_v42  ;;  %v2368_v42 = vld [vmem:[%s3598_s2 + $0x360] sm:$0xff]  ;;  %279 = vmatpush.msrb.mxu1 %v2361_v48 }
  0x2f   :  { %359 = vst [vmem:[#allocation1] ss:$4 sm:$0xff] %v355_v54  ;;  %v2344_v54 = vld [vmem:[%s3598_s2 + $0x368] sm:$0xff] }
  0x30   :  { %3792 = vst [vmem:[#allocation41_spill] sm:$0xff] %v2327_v63  ;;  %300 = vmatpush.msrb.mxu2 %v2344_v54  ;;  %v2419_v63 = vld [vmem:[%s3598_s2 + $0x3d8] sm:$0xff] }
  0x31   :  { %3793 = vst [vmem:[#allocation42_spill] sm:$0xff] %v2332_v61  ;;  %v2380_v61 = vld [vmem:[%s3598_s2 + $0x260] sm:$0xff] }
  0x32   :  { %3794 = vst [vmem:[#allocation43_spill] sm:$0xff] %v2337_v62  ;;  %v2385_v62 = vld [vmem:[%s3598_s2 + $0x2e8] sm:$0xff]  ;;  %301 = vmatpush.msrb.mxu2 %v2368_v42 }
  0x33   :  { %361 = vst [vmem:[#allocation1 + $0x20] ss:$4 sm:$0xff] %v356_v60  ;;  %v2356_v60 = vld [vmem:[%s3598_s2 + $0x268] sm:$0xff]  ;;  %280 = vmatpush.msrb.mxu1 %v2385_v62 }
  0x34   :  { %3795 = vst [vmem:[#allocation44_spill] sm:$0xff] %v2344_v54  ;;  %260 = vmatpush.msrb.mxu0 %v2356_v60  ;;  %v2392_v54 = vld [vmem:[%s3598_s2 + $0x358] sm:$0xff] }
  0x35   :  { %3796 = vst [vmem:[#allocation45_spill] sm:$0xff] %v2349_v47  ;;  %v2397_v47 = vld [vmem:[%s3598_s2 + $0x3e0] sm:$0xff]  ;;  %302 = vmatpush.msrb.mxu2 %v2392_v54 }
  0x36   :  { %3797 = vst [vmem:[#allocation46_spill] sm:$0xff] %v2356_v60  ;;  %v2409_v60 = vld [vmem:[%s3598_s2 + $0x2e0] sm:$0xff]  ;;  %261 = vmatpush.msrb.mxu0 %v2380_v61  ;;  %v363_v53 = vld.sshfl [vmem:[#allocation1 + $0x8] sm:$0xff pattern:$0x73625140]  ;;  %321 = vmatpush.msrb.mxu3 %v2397_v47 }
  0x37   :  { %3798 = vst [vmem:[#allocation47_spill] sm:$0xff] %v2361_v48  ;;  %v2414_v48 = vld [vmem:[%s3598_s2 + $0x350] sm:$0xff]  ;;  %v362_v46 = vld.sshfl [vmem:[#allocation1] sm:$0xff pattern:$0x73625140]  ;;  %281 = vmatpush.msrb.mxu1 %v2409_v60 }
  0x38   :  { %3799 = vst [vmem:[#allocation48_spill] sm:$0xff] %v2368_v42  ;;  %v2426_v42 = vld [vmem:[%s3598_s2 + $0x250] sm:$0xff]  ;;  %262 = vmatpush.msrb.mxu0 %v2402_v52  ;;  %v365_v40 = vld.sshfl [vmem:[#allocation1 + $0x18] sm:$0xff pattern:$0x73625140]  ;;  %303 = vmatpush.msrb.mxu2 %v2414_v48 }
  0x39   :  { %3800 = vst [vmem:[#allocation49_spill] sm:$0xff] %v2373_v51  ;;  %v2431_v51 = vld [vmem:[%s3598_s2 + $0x2d8] sm:$0xff]  ;;  %v364_v43 = vld.sshfl [vmem:[#allocation1 + $0x10] sm:$0xff pattern:$0x73625140]  ;;  %322 = vmatpush.msrb.mxu3 %v2419_v63 }
  0x3a   :  { %3801 = vst [vmem:[#allocation50_spill] sm:$0xff] %v2380_v61  ;;  %v2440_v61 = vld [vmem:[%s3598_s2 + $0x348] sm:$0xff]  ;;  %v366_v44 = vld.sshfl [vmem:[#allocation1 + $0x20] sm:$0xff pattern:$0x73625140]  ;;  %263 = vmatpush.msrb.mxu0 %v2426_v42  ;;  %282 = vmatpush.msrb.mxu1 %v2431_v51 }
  0x3b   :  { %3802 = vst [vmem:[#allocation51_spill] sm:$0xff] %v2385_v62  ;;  %v2445_v62 = vld [vmem:[%s3598_s2 + $0x3d0] sm:$0xff]  ;;  %304 = vmatpush.msrb.mxu2 %v2440_v61 }
  0x3c   :  { %3803 = vst [vmem:[#allocation52_spill] sm:$0xff] %v2392_v54  ;;  %v379_v54 = vsel %vm378_vm0, %v362_v46, 0.0  ;;  %323 = vmatpush.msrb.mxu3 %v2445_v62  ;;  %v2474_v46 = vld [vmem:[%s3598_s2 + $0x3c8] sm:$0xff] }
  0x3d   :  { %3804 = vst [vmem:[#allocation53_spill] sm:$0xff] %v2397_v47  ;;  %v382_v47 = vsel %vm378_vm0, %v364_v43, 0.0  ;;  %v2469_v43 = vld [vmem:[%s3598_s2 + $0x340] sm:$0xff] }
  0x3e   :  { %3805 = vst [vmem:[#allocation54_spill] sm:$0xff] %v2402_v52  ;;  %v380_v52 = vsel %vm378_vm0, %v363_v53, 0.0  ;;  %v2479_v53 = vld [vmem:[%s3598_s2 + $0x240] sm:$0xff]  ;;  %305 = vmatpush.msrb.mxu2 %v2469_v43  ;;  %324 = vmatpush.msrb.mxu3 %v2474_v46 }
  0x3f   :  { %3806 = vst [vmem:[#allocation55_spill] sm:$0xff] %v2409_v60  ;;  %v2457_v60 = vld [vmem:[%s3598_s2 + $0x248] sm:$0xff] }
  0x40   :  { %3807 = vst [vmem:[#allocation56_spill] sm:$0xff] %v2414_v48  ;;  %v2462_v48 = vld [vmem:[%s3598_s2 + $0x2d0] sm:$0xff]  ;;  %264 = vmatpush.msrb.mxu0 %v2457_v60 }
  0x41   :  { %3808 = vst [vmem:[#allocation57_spill] sm:$0xff] %v2419_v63  ;;  %v381_v63 = vadd.f32 %v380_v52, %v379_v54  ;;  %v384_v52 = vsel %vm378_vm0, %v365_v40, 0.0  ;;  %283 = vmatpush.msrb.mxu1 %v2462_v48  ;;  %v2487_v54 = vld [vmem:[%s3598_s2 + $0x2c8] sm:$0xff] }
  0x42   :  { %3809 = vst [vmem:[#allocation58_spill] sm:$0xff] %v2426_v42  ;;  %v367_v40 = vld.sshfl [vmem:[#allocation1 + $0x28] sm:$0xff pattern:$0x73625140]  ;;  %265 = vmatpush.msrb.mxu0 %v2479_v53 }
  0x43   :  { %3810 = vst [vmem:[#allocation59_spill] sm:$0xff] %v2431_v51  ;;  %v383_v42 = vadd.f32 %v382_v47, %v381_v63  ;;  %v386_v51 = vsel %vm378_vm0, %v366_v44, 0.0  ;;  %284 = vmatpush.msrb.mxu1 %v2487_v54  ;;  %v2517_v47 = vld [vmem:[%s3598_s2 + $0x330] sm:$0xff]  ;;  %v2522_v63 = vld [vmem:[%s3598_s2 + $0x3b8] sm:$0xff] }
  0x44   :  { %3811 = vst [vmem:[#allocation60_spill] sm:$0xff] %v2440_v61  ;;  %v2492_v61 = vld [vmem:[%s3598_s2 + $0x338] sm:$0xff]  ;;  %v2529_v44 = vld [vmem:[%s3598_s2 + $0x230] sm:$0xff] }
  0x45   :  { %3812 = vst [vmem:[#allocation61_spill] sm:$0xff] %v2445_v62  ;;  %v2497_v62 = vld [vmem:[%s3598_s2 + $0x3c0] sm:$0xff]  ;;  %306 = vmatpush.msrb.mxu2 %v2492_v61 }
  0x46   :  { %3813 = vst [vmem:[#allocation62_spill] sm:$0xff] %v2457_v60  ;;  %v2504_v60 = vld [vmem:[%s3598_s2 + $0x238] sm:$0xff]  ;;  %325 = vmatpush.msrb.mxu3 %v2497_v62 }
  0x47   :  { %3814 = vst [vmem:[#allocation63_spill] sm:$0xff] %v2462_v48  ;;  %v2509_v48 = vld [vmem:[%s3598_s2 + $0x2c0] sm:$0xff]  ;;  %266 = vmatpush.msrb.mxu0 %v2504_v60  ;;  %307 = vmatpush.msrb.mxu2 %v2517_v47 }
  0x48   :  { %3815 = vst [vmem:[#allocation64_spill] sm:$0xff] %v2469_v43  ;;  %v368_v43 = vld.sshfl [vmem:[#allocation1 + $0x30] sm:$0xff pattern:$0x73625140]  ;;  %285 = vmatpush.msrb.mxu1 %v2509_v48  ;;  %326 = vmatpush.msrb.mxu3 %v2522_v63 }
  0x49   :  { %3816 = vst [vmem:[#allocation65_spill] sm:$0xff] %v2474_v46  ;;  %v385_v46 = vadd.f32 %v384_v52, %v383_v42  ;;  %v2542_v42 = vld [vmem:[%s3598_s2 + $0x328] sm:$0xff]  ;;  %v2547_v52 = vld [vmem:[%s3598_s2 + $0x3b0] sm:$0xff]  ;;  %267 = vmatpush.msrb.mxu0 %v2529_v44 }
  0x4a   :  { %3817 = vst [vmem:[#allocation66_spill] sm:$0xff] %v2479_v53  ;;  %v2534_v53 = vld [vmem:[%s3598_s2 + $0x2b8] sm:$0xff]  ;;  %308 = vmatpush.msrb.mxu2 %v2542_v42  ;;  %327 = vmatpush.msrb.mxu3 %v2547_v52 }
  0x4b   :  { %3818 = vst [vmem:[#allocation67_spill] sm:$0xff] %v2487_v54  ;;  %v388_v54 = vsel %vm378_vm0, %v367_v40, 0.0  ;;  %v2554_v40 = vld [vmem:[%s3598_s2 + $0x228] sm:$0xff]  ;;  %286 = vmatpush.msrb.mxu1 %v2534_v53 }
  0x4c   :  { %3819 = vst [vmem:[#allocation68_spill] sm:$0xff] %v2492_v61  ;;  %v369_v61 = vld.sshfl [vmem:[#allocation1 + $0x38] sm:$0xff pattern:$0x73625140]  ;;  %268 = vmatpush.msrb.mxu0 %v2554_v40 }
  0x4d   :  { %3820 = vst [vmem:[#allocation69_spill] sm:$0xff] %v2497_v62  ;;  %v387_v62 = vadd.f32 %v386_v51, %v385_v46  ;;  %v2567_v51 = vld [vmem:[%s3598_s2 + $0x320] sm:$0xff]  ;;  %v2572_v46 = vld [vmem:[%s3598_s2 + $0x3a8] sm:$0xff] }
  0x4e   :  { %3821 = vst [vmem:[#allocation70_spill] sm:$0xff] %v2504_v60  ;;  %v2559_v60 = vld [vmem:[%s3598_s2 + $0x2b0] sm:$0xff]  ;;  %309 = vmatpush.msrb.mxu2 %v2567_v51  ;;  %328 = vmatpush.msrb.mxu3 %v2572_v46 }
  0x4f   :  { %3822 = vst [vmem:[#allocation71_spill] sm:$0xff] %v2509_v48  ;;  %v390_v48 = vsel %vm378_vm0, %v368_v43, 0.0  ;;  %v2579_v43 = vld [vmem:[%s3598_s2 + $0x220] sm:$0xff]  ;;  %287 = vmatpush.msrb.mxu1 %v2559_v60 }
  0x50   :  { %3823 = vst [vmem:[#allocation72_spill] sm:$0xff] %v2517_v47  ;;  %v389_v47 = vadd.f32 %v388_v54, %v387_v62  ;;  %v2592_v62 = vld [vmem:[%s3598_s2 + $0x318] sm:$0xff]  ;;  %269 = vmatpush.msrb.mxu0 %v2579_v43 }
  0x51   :  { %3824 = vst [vmem:[#allocation73_spill] sm:$0xff] %v2522_v63  ;;  %v2587_v63 = vld [vmem:[%s3598_s2 + $0x2a8] sm:$0xff]  ;;  %310 = vmatpush.msrb.mxu2 %v2592_v62 }
  0x52   :  { %3825 = vst [vmem:[#allocation74_spill] sm:$0xff] %v2529_v44  ;;  %v392_v44 = vsel %vm378_vm0, %v369_v61, 0.0  ;;  %v391_v54 = vadd.f32 %v390_v48, %v389_v47  ;;  %v2599_v61 = vld [vmem:[%s3598_s2 + $0x3a0] sm:$0xff]  ;;  %288 = vmatpush.msrb.mxu1 %v2587_v63  ;;  %v2608_v48 = vld [vmem:[%s3598_s2 + $0x218] sm:$0xff] }
  0x53   :  { %3826 = vst [vmem:[#allocation75_spill] sm:$0xff] %v2534_v53  ;;  %v2613_v47 = vld [vmem:[%s3598_s2 + $0x2a0] sm:$0xff]  ;;  %329 = vmatpush.msrb.mxu3 %v2599_v61  ;;  %270 = vmatpush.msrb.mxu0 %v2608_v48 }
  0x54   :  { %3827 = vst [vmem:[#allocation76_spill] sm:$0xff] %v2542_v42  ;;  %v393_v42 = vadd.f32 %v392_v44, %v391_v54  ;;  %v2625_v44 = vld [vmem:[%s3598_s2 + $0x398] sm:$0xff]  ;;  %v2631_v54 = vld [vmem:[%s3598_s2 + $0x210] sm:$0xff]  ;;  %289 = vmatpush.msrb.mxu1 %v2613_v47  ;;  %311 = vmatpush.msrb.mxu2 %v2620_v57 }
  0x55   :  { %3828 = vst [vmem:[#allocation77_spill] sm:$0xff] %v2547_v52  ;;  %330 = vmatpush.msrb.mxu3 %v2625_v44  ;;  %271 = vmatpush.msrb.mxu0 %v2631_v54 }
  0x56   :  { %3829 = vst [vmem:[#allocation78_spill] sm:$0xff] %v2554_v40  ;;  %394 = vadd.xlane.f32.xlu0 %v393_v42  ;;  %v2643_v42 = vld [vmem:[%s3598_s2 + $0x308] sm:$0xff]  ;;  %290 = vmatpush.msrb.mxu1 %v2638_v55 }
  0x57   :  { %3830 = vst [vmem:[#allocation79_spill] sm:$0xff] %v2559_v60  ;;  %312 = vmatpush.msrb.mxu2 %v2643_v42  ;;  %331 = vmatpush.msrb.mxu3 %v2650_v59 }
  0x58   :  { %3831 = vst [vmem:[#allocation80_spill] sm:$0xff] %v2567_v51 }
  0x59   :  { %3832 = vst [vmem:[#allocation81_spill] sm:$0xff] %v2572_v46  ;;  %332 = vmatpush.msrb.mxu3 %v2674_v50 }
  0x5a   :  { %3833 = vst [vmem:[#allocation82_spill] sm:$0xff] %v2579_v43 }
  0x5b   :  { %3834 = vst [vmem:[#allocation83_spill] sm:$0xff] %v2587_v63 }
  0x5c   :  { %3835 = vst [vmem:[#allocation84_spill] sm:$0xff] %v2592_v62  ;;  %v2655_v62 = vld [vmem:[%s3598_s2 + $0x208] sm:$0xff] }
  0x5d   :  { %3836 = vst [vmem:[#allocation85_spill] sm:$0xff] %v2599_v61  ;;  %272 = vmatpush.msrb.mxu0 %v2655_v62 }
  0x5e   :  { %3837 = vst [vmem:[#allocation86_spill] sm:$0xff] %v2608_v48 }
  0x5f   :  { %3838 = vst [vmem:[#allocation87_spill] sm:$0xff] %v2613_v47 }
  0x60   :  { %3839 = vst [vmem:[#allocation88_spill] sm:$0xff] %v2620_v57  ;;  %v2662_v57 = vld [vmem:[%s3598_s2 + $0x290] sm:$0xff] }
  0x61   :  { %3840 = vst [vmem:[#allocation89_spill] sm:$0xff] %v2625_v44  ;;  %v2667_v44 = vld [vmem:[%s3598_s2 + $0x300] sm:$0xff]  ;;  %291 = vmatpush.msrb.mxu1 %v2662_v57 }
  0x62   :  { %3841 = vst [vmem:[#allocation90_spill] sm:$0xff] %v2631_v54  ;;  %v2681_v54 = vld [vmem:[%s3598_s2 + $0x200] sm:$0xff]  ;;  %313 = vmatpush.msrb.mxu2 %v2667_v44 }
  0x63   :  { %3842 = vst [vmem:[#allocation91_spill] sm:$0xff] %v2638_v55  ;;  %v2686_v55 = vld [vmem:[%s3598_s2 + $0x288] sm:$0xff]  ;;  %314 = vmatmul.f32.vlgmr.msrb.gmra.mxu2 %v2317_v56  ;;  %273 = vmatpush.msrb.mxu0 %v2681_v54  ;;  %v3873_v56 = vld [vmem:[#allocation41_spill] sm:$0xff] }
  0x64   :  { %3843 = vst [vmem:[#allocation92_spill] sm:$0xff] %v2643_v42  ;;  %v2693_v42 = vld [vmem:[%s3598_s2 + $0x380] sm:$0xff]  ;;  %292 = vmatpush.msrb.mxu1 %v2686_v55  ;;  %274 = vmatmul.f32.vlgmr.msrb.gmra.mxu0 %v2311_v49  ;;  %v3872_v49 = vld [vmem:[#allocation35_spill] sm:$0xff] }
  0x65   :  { %3844 = vst [vmem:[#allocation93_spill] sm:$0xff] %v2650_v59  ;;  %333 = vmatpush.msrb.mxu3 %v2693_v42  ;;  %436 = vmatpush.msra.mxu0 %v1891_v1  ;;  %v3854_v1 = vld [vmem:[#allocation11_spill] sm:$0xff] }
  0x66   :  { %3845 = vst [vmem:[#allocation94_spill] sm:$0xff] %v2655_v62  ;;  %v2700_v62 = vld [vmem:[%s3598_s2 + $0x280] sm:$0xff]  ;;  %334 = vmatmul.f32.vlgmr.msrb.gmra.mxu3 %v2319_v58  ;;  %476 = vmatpush.msra.mxu2 %v1886_v0  ;;  %v3874_v58 = vld [vmem:[#allocation31_spill] sm:$0xff] }
  0x67   :  { %3846 = vst [vmem:[#allocation95_spill] sm:$0xff] %v2662_v57  ;;  %293 = vmatpush.msrb.mxu1 %v2700_v62  ;;  %496 = vmatpush.msra.mxu3 %v1903_v3  ;;  %v3853_v0 = vld [vmem:[#allocation14_spill] sm:$0xff]  ;;  %v3856_v3 = vld [vmem:[#allocation15_spill] sm:$0xff] }
  0x68   :  { %3847 = vst [vmem:[#allocation96_spill] sm:$0xff] %v2667_v44  ;;  %294 = vmatmul.f32.vlgmr.msrb.gmra.mxu1 %v2313_v45  ;;  %437 = vmatpush.msra.mxu0 %v1908_v4  ;;  %v3857_v4 = vld [vmem:[#allocation19_spill] sm:$0xff]  ;;  %v3871_v45 = vld [vmem:[#allocation32_spill] sm:$0xff] }
  0x69   :  { %3848 = vst [vmem:[#allocation97_spill] sm:$0xff] %v2674_v50  ;;  %456 = vmatpush.msra.mxu1 %v1913_v5  ;;  %477 = vmatpush.msra.mxu2 %v1896_v2  ;;  %v3855_v2 = vld [vmem:[#allocation13_spill] sm:$0xff]  ;;  %v3858_v5 = vld [vmem:[#allocation12_spill] sm:$0xff] }
  0x6a   :  { %3849 = vst [vmem:[#allocation98_spill] sm:$0xff] %v2681_v54  ;;  %497 = vmatpush.msra.mxu3 %v1925_v7  ;;  %438 = vmatpush.msra.mxu0 %v1930_v8  ;;  %v3860_v7 = vld [vmem:[#allocation21_spill] sm:$0xff]  ;;  %v3861_v8 = vld [vmem:[#allocation24_spill] sm:$0xff] }
  0x6b   :  { %3850 = vst [vmem:[#allocation99_spill] sm:$0xff] %v2686_v55  ;;  %457 = vmatpush.msra.mxu1 %v1937_v9  ;;  %478 = vmatpush.msra.mxu2 %v1920_v6  ;;  %v3859_v6 = vld [vmem:[#allocation18_spill] sm:$0xff] }
  0x6c   :  { %3851 = vst [vmem:[#allocation100_spill] sm:$0xff] %v2693_v42  ;;  %498 = vmatpush.msra.mxu3 %v1942_v10  ;;  %439 = vmatpush.msra.mxu0 %v1954_v12  ;;  %v3862_v10 = vld [vmem:[#allocation20_spill] sm:$0xff]  ;;  %v3864_v12 = vld [vmem:[#allocation25_spill] sm:$0xff] }
  0x6d   :  { %3852 = vst [vmem:[#allocation101_spill] sm:$0xff] %v2700_v62  ;;  %458 = vmatpush.msra.mxu1 %v1959_v13  ;;  %479 = vmatpush.msra.mxu2 %v1949_v11  ;;  %v3863_v11 = vld [vmem:[#allocation23_spill] sm:$0xff] }
  0x6e   :  { %499 = vmatpush.msra.mxu3 %v1966_v14  ;;  %440 = vmatpush.msra.mxu0 %v1983_v17  ;;  %v3865_v14 = vld [vmem:[#allocation29_spill] sm:$0xff]  ;;  %v3868_v17 = vld [vmem:[#allocation28_spill] sm:$0xff] }
  0x6f   :  { %459 = vmatpush.msra.mxu1 %v1971_v15  ;;  %480 = vmatpush.msra.mxu2 %v1978_v16  ;;  %v3866_v15 = vld [vmem:[#allocation22_spill] sm:$0xff]  ;;  %v3867_v16 = vld [vmem:[#allocation27_spill] sm:$0xff] }
  0x70   :  { %500 = vmatpush.msra.mxu3 %v1990_v18  ;;  %441 = vmatpush.msra.mxu0 %v2007_v21  ;;  %v3869_v18 = vld [vmem:[#allocation36_spill] sm:$0xff] }
  0x71   :  { %460 = vmatpush.msra.mxu1 %v1995_v19  ;;  %481 = vmatpush.msra.mxu2 %v2002_v20  ;;  %v3870_v20 = vld [vmem:[#allocation26_spill] sm:$0xff] }
  0x72   :  { %501 = vmatpush.msra.mxu3 %v2014_v22  ;;  %442 = vmatpush.msra.mxu0 %v2031_v25 }
  0x73   :  { %461 = vmatpush.msra.mxu1 %v2019_v23  ;;  %482 = vmatpush.msra.mxu2 %v2026_v24 }
  0x74   :  { %502 = vmatpush.msra.mxu3 %v2038_v26  ;;  %443 = vmatpush.msra.mxu0 %v2055_v29 }
  0x75   :  { %462 = vmatpush.msra.mxu1 %v2043_v27  ;;  %483 = vmatpush.msra.mxu2 %v2050_v28 }
  0x76   :  { %503 = vmatpush.msra.mxu3 %v2062_v30  ;;  %444 = vmatpush.msra.mxu0 %v2079_v33 }
  0x77   :  { %463 = vmatpush.msra.mxu1 %v2067_v31  ;;  %484 = vmatpush.msra.mxu2 %v2074_v32 }
  0x78   :  { %504 = vmatpush.msra.mxu3 %v2086_v34  ;;  %445 = vmatpush.msra.mxu0 %v2103_v37 }
  0x79   :  { %464 = vmatpush.msra.mxu1 %v2091_v35  ;;  %485 = vmatpush.msra.mxu2 %v2098_v36 }
  0x7a   :  { %505 = vmatpush.msra.mxu3 %v2110_v38  ;;  %446 = vmatpush.msra.mxu0 %v2127_v41 }
  0x7b   :  { %465 = vmatpush.msra.mxu1 %v2115_v39  ;;  %486 = vmatpush.msra.mxu2 %v3854_v1 }
  0x7c   :  { %506 = vmatpush.msra.mxu3 %v3855_v2  ;;  %447 = vmatpush.msra.mxu0 %v3856_v3 }
  0x7d   :  { %466 = vmatpush.msra.mxu1 %v3853_v0  ;;  %487 = vmatpush.msra.mxu2 %v3858_v5 }
  0x7e   :  { %507 = vmatpush.msra.mxu3 %v3859_v6  ;;  %448 = vmatpush.msra.mxu0 %v3860_v7 }
  0x7f   :  { %467 = vmatpush.msra.mxu1 %v3857_v4  ;;  %488 = vmatpush.msra.mxu2 %v3862_v10 }
  0x80   :  { %508 = vmatpush.msra.mxu3 %v3863_v11  ;;  %449 = vmatpush.msra.mxu0 %v3864_v12  ;;  %v3875_v12 = vld [vmem:[#allocation37_spill] sm:$0xff] }
  0x81   :  { %468 = vmatpush.msra.mxu1 %v3861_v8  ;;  %489 = vmatpush.msra.mxu2 %v3866_v15  ;;  %v3877_v15 = vld [vmem:[#allocation43_spill] sm:$0xff] }
  0x82   :  { %509 = vmatpush.msra.mxu3 %v3867_v16  ;;  %450 = vmatpush.msra.mxu0 %v3868_v17  ;;  %v3878_v16 = vld [vmem:[#allocation34_spill] sm:$0xff]  ;;  %v3879_v17 = vld [vmem:[#allocation39_spill] sm:$0xff] }
  0x83   :  { %469 = vmatpush.msra.mxu1 %v3865_v14  ;;  %490 = vmatpush.msra.mxu2 %v3870_v20  ;;  %v3876_v14 = vld [vmem:[#allocation38_spill] sm:$0xff]  ;;  %v3881_v20 = vld [vmem:[#allocation47_spill] sm:$0xff] }
  0x84   :  { %510 = vmatpush.msra.mxu3 %v3871_v45  ;;  %451 = vmatpush.msra.mxu0 %v3872_v49  ;;  %v3882_v45 = vld [vmem:[#allocation40_spill] sm:$0xff]  ;;  %v3883_v49 = vld [vmem:[#allocation45_spill] sm:$0xff] }
  0x85   :  { %470 = vmatpush.msra.mxu1 %v3869_v18  ;;  %491 = vmatpush.msra.mxu2 %v3874_v58  ;;  %v3880_v18 = vld [vmem:[#allocation42_spill] sm:$0xff]  ;;  %v3885_v58 = vld [vmem:[#allocation51_spill] sm:$0xff] }
  0x86   :  { %511 = vmatpush.msra.mxu3 %v3875_v12  ;;  %516 = vmatpush.msrb.mxu0 %v3876_v14  ;;  %v3886_v12 = vld [vmem:[#allocation44_spill] sm:$0xff]  ;;  %v3887_v14 = vld [vmem:[#allocation49_spill] sm:$0xff] }
  0x87   :  { %471 = vmatpush.msra.mxu1 %v3873_v56  ;;  %556 = vmatpush.msrb.mxu2 %v3878_v16  ;;  %v3884_v56 = vld [vmem:[#allocation46_spill] sm:$0xff]  ;;  %v3889_v16 = vld [vmem:[#allocation55_spill] sm:$0xff] }
  0x88   :  { %576 = vmatpush.msrb.mxu3 %v3879_v17  ;;  %517 = vmatpush.msrb.mxu0 %v3880_v18  ;;  %v3890_v17 = vld [vmem:[#allocation48_spill] sm:$0xff]  ;;  %v3891_v18 = vld [vmem:[#allocation53_spill] sm:$0xff] }
  0x89   :  { %536 = vmatpush.msrb.mxu1 %v3877_v15  ;;  %557 = vmatpush.msrb.mxu2 %v3882_v45  ;;  %v3888_v15 = vld [vmem:[#allocation50_spill] sm:$0xff]  ;;  %v3893_v45 = vld [vmem:[#allocation59_spill] sm:$0xff] }
  0x8a   :  { %577 = vmatpush.msrb.mxu3 %v3883_v49  ;;  %518 = vmatpush.msrb.mxu0 %v3884_v56  ;;  %v3894_v49 = vld [vmem:[#allocation52_spill] sm:$0xff]  ;;  %v3895_v56 = vld [vmem:[#allocation57_spill] sm:$0xff] }
  0x8b   :  { %537 = vmatpush.msrb.mxu1 %v3881_v20  ;;  %558 = vmatpush.msrb.mxu2 %v3886_v12  ;;  %v3892_v20 = vld [vmem:[#allocation54_spill] sm:$0xff]  ;;  %v3897_v12 = vld [vmem:[#allocation63_spill] sm:$0xff] }
  0x8c   :  { %578 = vmatpush.msrb.mxu3 %v3887_v14  ;;  %519 = vmatpush.msrb.mxu0 %v3888_v15  ;;  %v3898_v14 = vld [vmem:[#allocation56_spill] sm:$0xff]  ;;  %v3899_v15 = vld [vmem:[#allocation61_spill] sm:$0xff] }
  0x8d   :  { %538 = vmatpush.msrb.mxu1 %v3885_v58  ;;  %559 = vmatpush.msrb.mxu2 %v3890_v17  ;;  %v3896_v58 = vld [vmem:[#allocation58_spill] sm:$0xff]  ;;  %v3901_v17 = vld [vmem:[#allocation67_spill] sm:$0xff] }
  0x8e   :  { %579 = vmatpush.msrb.mxu3 %v3891_v18  ;;  %520 = vmatpush.msrb.mxu0 %v3892_v20  ;;  %v3902_v18 = vld [vmem:[#allocation60_spill] sm:$0xff]  ;;  %v3903_v20 = vld [vmem:[#allocation65_spill] sm:$0xff] }
  0x8f   :  { %539 = vmatpush.msrb.mxu1 %v3889_v16  ;;  %560 = vmatpush.msrb.mxu2 %v3894_v49  ;;  %v3900_v16 = vld [vmem:[#allocation62_spill] sm:$0xff]  ;;  %v3905_v49 = vld [vmem:[#allocation71_spill] sm:$0xff] }
  0x90   :  { %580 = vmatpush.msrb.mxu3 %v3895_v56  ;;  %521 = vmatpush.msrb.mxu0 %v3896_v58  ;;  %v3906_v56 = vld [vmem:[#allocation64_spill] sm:$0xff]  ;;  %v3907_v58 = vld [vmem:[#allocation69_spill] sm:$0xff] }
  0x91   :  { %540 = vmatpush.msrb.mxu1 %v3893_v45  ;;  %561 = vmatpush.msrb.mxu2 %v3898_v14  ;;  %v3904_v45 = vld [vmem:[#allocation66_spill] sm:$0xff] }
  0x92   :  { %581 = vmatpush.msrb.mxu3 %v3899_v15  ;;  %522 = vmatpush.msrb.mxu0 %v3900_v16  ;;  %v3909_v15 = vld [vmem:[#allocation68_spill] sm:$0xff]  ;;  %v3910_v16 = vld [vmem:[#allocation73_spill] sm:$0xff] }
  0x93   :  { %541 = vmatpush.msrb.mxu1 %v3897_v12  ;;  %562 = vmatpush.msrb.mxu2 %v3902_v18  ;;  %v3908_v12 = vld [vmem:[#allocation70_spill] sm:$0xff] }
  0x94   :  { %582 = vmatpush.msrb.mxu3 %v3903_v20  ;;  %523 = vmatpush.msrb.mxu0 %v3904_v45  ;;  %v3912_v20 = vld [vmem:[#allocation72_spill] sm:$0xff] }
  0x95   :  { %542 = vmatpush.msrb.mxu1 %v3901_v17  ;;  %563 = vmatpush.msrb.mxu2 %v3906_v56  ;;  %v3911_v17 = vld [vmem:[#allocation74_spill] sm:$0xff] }
  0x96   :  { %583 = vmatpush.msrb.mxu3 %v3907_v58  ;;  %524 = vmatpush.msrb.mxu0 %v3908_v12  ;;  %v3913_v58 = vld [vmem:[#allocation76_spill] sm:$0xff] }
  0x97   :  { %543 = vmatpush.msrb.mxu1 %v3905_v49  ;;  %564 = vmatpush.msrb.mxu2 %v3909_v15 }
  0x98   :  { %584 = vmatpush.msrb.mxu3 %v3910_v16  ;;  %525 = vmatpush.msrb.mxu0 %v3911_v17 }
  0x99   :  { %544 = vmatpush.msrb.mxu1 %v2534_v53  ;;  %565 = vmatpush.msrb.mxu2 %v3912_v20  ;;  %v3914_v20 = vld [vmem:[#allocation91_spill] sm:$0xff]  ;;  %v3922_v53 = vld [vmem:[#allocation33_spill] sm:$0xff] }
  0x9a   :  { %585 = vmatpush.msrb.mxu3 %v2547_v52  ;;  %526 = vmatpush.msrb.mxu0 %v2554_v40  ;;  %v3915_v52 = vld [vmem:[#allocation84_spill] sm:$0xff]  ;;  %v3916_v40 = vld [vmem:[#allocation89_spill] sm:$0xff] }
  0x9b   :  { %545 = vmatpush.msrb.mxu1 %v2559_v60  ;;  %566 = vmatpush.msrb.mxu2 %v3913_v58 }
  0x9c   :  { %586 = vmatpush.msrb.mxu3 %v2572_v46  ;;  %527 = vmatpush.msrb.mxu0 %v2579_v43  ;;  %v3918_v46 = vld [vmem:[#allocation88_spill] sm:$0xff] }
  0x9d   :  { %546 = vmatpush.msrb.mxu1 %v2587_v63  ;;  %567 = vmatpush.msrb.mxu2 %v2567_v51  ;;  %v3917_v63 = vld [vmem:[#allocation90_spill] sm:$0xff] }
  0x9e   :  { %587 = vmatpush.msrb.mxu3 %v2599_v61  ;;  %528 = vmatpush.msrb.mxu0 %v2608_v48  ;;  %v3920_v61 = vld [vmem:[#allocation92_spill] sm:$0xff] }
  0x9f   :  { %547 = vmatpush.msrb.mxu1 %v2613_v47  ;;  %568 = vmatpush.msrb.mxu2 %v3915_v52  ;;  %v3919_v47 = vld [vmem:[#allocation94_spill] sm:$0xff] }
  0xa0   :  { %588 = vmatpush.msrb.mxu3 %v3916_v40  ;;  %529 = vmatpush.msrb.mxu0 %v3917_v63  ;;  %v1844_v40 = vmov 269488144  }
  0xa1   :  { %548 = vmatpush.msrb.mxu1 %v3914_v20  ;;  %569 = vmatpush.msrb.mxu2 %v3918_v46 }
  0xa2   :  { %589 = vmatpush.msrb.mxu3 %v2650_v59  ;;  %530 = vmatpush.msrb.mxu0 %v3919_v47  ;;  %v1631_v47 = vld [vmem:[%s3599_s3] ss:$0 sm:$0xff] }
  0xa3   :  { %549 = vmatpush.msrb.mxu1 %v2662_v57  ;;  %570 = vmatpush.msrb.mxu2 %v3920_v61  ;;  %v195_v59 = vpop.f32.mrf.mxu0 }
  0xa4   :  { %590 = vmatpush.msrb.mxu3 %v2674_v50  ;;  %531 = vmatpush.msrb.mxu0 %v2681_v54  ;;  %v196_v63 = vadd.f32 %v1631_v47, %v195_v59  ;;  %v409_v54 = vunpack.c.l.s4 %v1844_v40  ;;  %v3921_v40 = vld [vmem:[#allocation30_spill] sm:$0xff] }
  0xa5   :  { %550 = vmatpush.msrb.mxu1 %v2686_v55  ;;  %571 = vmatpush.msrb.mxu2 %v2667_v44 }
  0xa6   :  { %591 = vmatpush.msrb.mxu3 %v2693_v42  ;;  %v215_v52 = vpop.f32.mrf.mxu1  ;;  %v410_v51 = vunpack.c.0.s8 %v409_v54 }
  0xa7   :  { %551 = vmatpush.msrb.mxu1 %v2700_v62  ;;  %v235_v62 = vpop.f32.mrf.mxu2  ;;  %v216_v44 = vadd.f32 %v215_v52, %v196_v63 }
  0xa9   :  { %v236_v42 = vadd.f32 %v235_v62, %v216_v44 }
  0xc9   :  { %v395_v57 = vpop.xlane.xlu0 %394 }
  0xca   :  { %v396_v46 = vadd.f32 1e-16, %v395_v57  ;;  %v255_v57 = vpop.f32.mrf.mxu3 }
  0xcb   :  { %v256_v58 = vadd.f32 %v255_v57, %v236_v42 }
  0xcc   :  { %1632 = vrsqrt.f32 %v396_v46  ;;  %vm403_vm2 = vweird.f32 %v396_v46 }
  0xd2   :  { %v1633_v55 = vpop.eup %1632 }
  0xd3   :  { %v398_v61 = vmul.f32 %v1633_v55, %v396_v46  ;;  %vm404_vm1 = vweird.f32 %v1633_v55 }
  0xd4   :  { %vm405_vm3 = vmor %vm403_vm2, %vm404_vm1 }
  0xd5   :  { %v399_v50 = vmul.f32 %v1633_v55, %v398_v61 }
  0xd7   :  { %v400_v20 = vmul.f32 0.5, %v399_v50 }
  0xd9   :  { %v401_v48 = vsub.f32 1.5, %v400_v20 }
  0xdb   :  { %v402_v43 = vmul.f32 %v1633_v55, %v401_v48 }
  0xdd   :  { %v406_v17 = vsel %vm405_vm3, %v1633_v55, %v402_v43 }
  0xde   :  { %v411_v47 = vperm.slane %v406_v17, %v410_v51 }
  0xe0   :  { %v413_v15 = vmul.f32 %v411_v47, %v3921_v40  ;;  %v414_v50 = vmul.f32 %v411_v47, %v3922_v53 }
  0xe1   :  { %v275_v60 = vpop.f32.mrf.mxu0 }
  0xe2   :  { %v276_v16 = vadd.f32 %v275_v60, %v256_v58  ;;  %417 = vst [vmem:[#allocation1] ss:$4 sm:$0xff] %v413_v15 }
  0xe3   :  { %419 = vst [vmem:[#allocation1 + $0x20] ss:$4 sm:$0xff] %v414_v50 }
  0xe5   :  { %v295_v61 = vpop.f32.mrf.mxu1 }
  0xe6   :  { %v296_v59 = vadd.f32 %v295_v61, %v276_v16  ;;  %v315_v63 = vpop.f32.mrf.mxu2 }
  0xe8   :  { %v316_v52 = vadd.f32 %v315_v63, %v296_v59 }
  0xe9   :  { %v335_v62 = vpop.f32.mrf.mxu3  ;;  %v420_v60 = vld.sshfl [vmem:[#allocation1] sm:$0xff pattern:$0x73625140]  ;;  %v421_v51 = vld.sshfl [vmem:[#allocation1 + $0x8] sm:$0xff pattern:$0x73625140] }
  0xea   :  { %v2842_v48 = vadd.f32 %v335_v62, %v316_v52  ;;  %452 = vmatmul.f32.vlgmr.msra.gmra.mxu0 %v420_v60  ;;  %472 = vmatmul.f32.vlgmr.msra.gmra.mxu1 %v421_v51  ;;  %v422_v43 = vld.sshfl [vmem:[#allocation1 + $0x10] sm:$0xff pattern:$0x73625140]  ;;  %v423_v44 = vld.sshfl [vmem:[#allocation1 + $0x18] sm:$0xff pattern:$0x73625140] }
  0xeb   :  { %492 = vmatmul.f32.vlgmr.msra.gmra.mxu2 %v422_v43  ;;  %512 = vmatmul.f32.vlgmr.msra.gmra.mxu3 %v423_v44  ;;  %v424_v53 = vld.sshfl [vmem:[#allocation1 + $0x20] sm:$0xff pattern:$0x73625140]  ;;  %v425_v54 = vld.sshfl [vmem:[#allocation1 + $0x28] sm:$0xff pattern:$0x73625140] }
  0xec   :  { %v339_v46 = vsel %vm338_vm4, %v2842_v48, -inf  ;;  %v426_v55 = vld.sshfl [vmem:[#allocation1 + $0x30] sm:$0xff pattern:$0x73625140] }
  0xed   :  { %340 = vmax.xlane.f32.xlu0 %v339_v46  ;;  %v427_v42 = vld.sshfl [vmem:[#allocation1 + $0x38] sm:$0xff pattern:$0x73625140] }
  0xf2   :  { %532 = vmatmul.f32.vlgmr.msrb.gmra.mxu0 %v424_v53  ;;  %552 = vmatmul.f32.vlgmr.msrb.gmra.mxu1 %v425_v54 }
  0xf3   :  { %572 = vmatmul.f32.vlgmr.msrb.gmra.mxu2 %v426_v55  ;;  %592 = vmatmul.f32.vlgmr.msrb.gmra.mxu3 %v427_v42 }
 0x160   :  { %v341_v40 = vpop.xlane.xlu0 %340 }
 0x161   :  { %v2847_v52 = vsub.f32 %v2842_v48, %v341_v40  ;;  %v2923_v40 = vld [vmem:[%s3598_s2 + $0x1e8] sm:$0xff] }
 0x163   :  { %v343_v43 = vmul.f32 1.442695, %v2847_v52 }
 0x165   :  { %1634 = vpow2.f32 %v343_v43  ;;  %v2967_v43 = vld [vmem:[%s3598_s2 + $0x158] sm:$0xff] }
 0x167   :  { %v453_v15 = vpop.f32.mrf.mxu0  ;;  %v473_v16 = vpop.f32.mrf.mxu1 }
 0x168   :  { %v474_v17 = vadd.f32 %v473_v16, %v453_v15  ;;  %v2856_v15 = vld [vmem:[%s3598_s2 + $0x78] sm:$0xff] }
 0x169   :  { %1489 = vmatpush.xpose.msk.msra.mxu0 %vm623_vm5, %v2856_v15  ;;  %v2863_v16 = vld [vmem:[%s3598_s2 + $0xf8] sm:$0xff] }
 0x16a   :  { %1506 = vmatpush.xpose.msk.msra.mxu1 %vm623_vm5, %v2863_v16 }
 0x16b   :  { %v1635_v55 = vpop.eup %1634 }
 0x16c   :  { %v345_v42 = vsel %vm338_vm4, %v1635_v55, 0.0  ;;  %v3954_v55 = vld [vmem:[#allocation57_spill] sm:$0xff] }
 0x16e   :  { %v493_v20 = vpop.f32.mrf.mxu2  ;;  %v513_v58 = vpop.f32.mrf.mxu3  ;;  %1507 = vmatpush.xpose.msk.msra.mxu1 %vm623_vm5, %v1937_v9  ;;  %v2907_v9 = vld [vmem:[%s3598_s2 + $0x68] sm:$0xff] }
 0x16f   :  { %v494_v57 = vadd.f32 %v493_v20, %v474_v17  ;;  %v533_v61 = vpop.f32.mrf.mxu0  ;;  %v553_v50 = vpop.f32.mrf.mxu1  ;;  %v2870_v17 = vld [vmem:[%s3598_s2 + $0x178] sm:$0xff] }
 0x170   :  { %1523 = vmatpush.xpose.msk.msra.mxu2 %vm623_vm5, %v2870_v17  ;;  %v2877_v20 = vld [vmem:[%s3598_s2 + $0x1f8] sm:$0xff] }
 0x171   :  { %v514_v47 = vadd.f32 %v513_v58, %v494_v57  ;;  %1540 = vmatpush.xpose.msk.msra.mxu3 %vm623_vm5, %v2877_v20  ;;  %v2884_v58 = vld [vmem:[%s3598_s2 + $0x70] sm:$0xff] }
 0x172   :  { %1490 = vmatpush.xpose.msk.msra.mxu0 %vm623_vm5, %v2884_v58  ;;  %v2893_v57 = vld [vmem:[%s3598_s2 + $0x170] sm:$0xff]  ;;  %1508 = vmatpush.xpose.msk.msra.mxu1 %vm623_vm5, %v1959_v13  ;;  %v2930_v13 = vld [vmem:[%s3598_s2 + $0x60] sm:$0xff] }
 0x173   :  { %v534_v59 = vadd.f32 %v533_v61, %v514_v47  ;;  %v2900_v47 = vld [vmem:[%s3598_s2 + $0x1f0] sm:$0xff] }
 0x174   :  { %1524 = vmatpush.xpose.msk.msra.mxu2 %vm623_vm5, %v2893_v57 }
 0x175   :  { %v554_v63 = vadd.f32 %v553_v50, %v534_v59  ;;  %1541 = vmatpush.xpose.msk.msra.mxu3 %vm623_vm5, %v2900_v47  ;;  %v2916_v59 = vld [vmem:[%s3598_s2 + $0x168] sm:$0xff] }
 0x176   :  { %v573_v62 = vpop.f32.mrf.mxu2  ;;  %v593_v60 = vpop.f32.mrf.mxu3  ;;  %1491 = vmatpush.xpose.msk.msra.mxu0 %vm623_vm5, %v2907_v9 }
 0x177   :  { %v574_v46 = vadd.f32 %v573_v62, %v554_v63  ;;  %v2937_v62 = vld [vmem:[%s3598_s2 + $0xe0] sm:$0xff] }
 0x178   :  { %1525 = vmatpush.xpose.msk.msra.mxu2 %vm623_vm5, %v2916_v59  ;;  %1509 = vmatpush.xpose.msk.msra.mxu1 %vm623_vm5, %v2937_v62 }
 0x179   :  { %v594_v51 = vadd.f32 %v593_v60, %v574_v46  ;;  %1542 = vmatpush.xpose.msk.msra.mxu3 %vm623_vm5, %v2923_v40  ;;  %v2944_v46 = vld [vmem:[%s3598_s2 + $0x160] sm:$0xff] }
 0x17a   :  { %1492 = vmatpush.xpose.msk.msra.mxu0 %vm623_vm5, %v2930_v13  ;;  %v2951_v60 = vld [vmem:[%s3598_s2 + $0x1e0] sm:$0xff] }
 0x17b   :  { %v596_v44 = vmul.f32 0.01, %v594_v51  ;;  %v2958_v51 = vld [vmem:[%s3598_s2 + $0x58] sm:$0xff] }
 0x17c   :  { %1526 = vmatpush.xpose.msk.msra.mxu2 %vm623_vm5, %v2944_v46  ;;  %1510 = vmatpush.xpose.msk.msra.mxu1 %vm623_vm5, %v1995_v19 }
 0x17d   :  { %v597_v53 = vadd.f32 %v596_v44, %v2842_v48  ;;  %1543 = vmatpush.xpose.msk.msra.mxu3 %vm623_vm5, %v2951_v60  ;;  %v2974_v44 = vld [vmem:[%s3598_s2 + $0x1d8] sm:$0xff] }
 0x17e   :  { %1493 = vmatpush.xpose.msk.msra.mxu0 %vm623_vm5, %v2958_v51 }
 0x17f   :  { %v598_v54 = vsel %vm338_vm4, %v597_v53, -inf }
 0x180   :  { %599 = vmax.xlane.f32.xlu1 %v598_v54  ;;  %1527 = vmatpush.xpose.msk.msra.mxu2 %vm623_vm5, %v2967_v43  ;;  %v2989_v54 = vld [vmem:[%s3598_s2 + $0x150] sm:$0xff] }
 0x181   :  { %1544 = vmatpush.xpose.msk.msra.mxu3 %vm623_vm5, %v2974_v44  ;;  %1511 = vmatpush.xpose.msk.msra.mxu1 %vm623_vm5, %v2019_v23  ;;  %v3925_v23 = vld [vmem:[#allocation22_spill] sm:$0xff] }
 0x182   :  { %1494 = vmatpush.xpose.msk.msra.mxu0 %vm623_vm5, %v2007_v21  ;;  %v3923_v21 = vld [vmem:[#allocation25_spill] sm:$0xff] }
 0x184   :  { %1528 = vmatpush.xpose.msk.msra.mxu2 %vm623_vm5, %v2989_v54 }
 0x185   :  { %1545 = vmatpush.xpose.msk.msra.mxu3 %vm623_vm5, %v2014_v22  ;;  %1512 = vmatpush.xpose.msk.msra.mxu1 %vm623_vm5, %v2043_v27  ;;  %v3924_v22 = vld [vmem:[#allocation29_spill] sm:$0xff]  ;;  %v3929_v27 = vld [vmem:[#allocation26_spill] sm:$0xff] }
 0x186   :  { %1495 = vmatpush.xpose.msk.msra.mxu0 %vm623_vm5, %v2031_v25  ;;  %v3927_v25 = vld [vmem:[#allocation28_spill] sm:$0xff] }
 0x188   :  { %346 = vadd.xlane.f32.xlu1 %v345_v42  ;;  %1529 = vmatpush.xpose.msk.msra.mxu2 %vm623_vm5, %v2026_v24  ;;  %v3926_v24 = vld [vmem:[#allocation27_spill] sm:$0xff]  ;;  %v3955_v42 = vld [vmem:[#allocation58_spill] sm:$0xff] }
 0x189   :  { %1546 = vmatpush.xpose.msk.msra.mxu3 %vm623_vm5, %v2038_v26  ;;  %1513 = vmatpush.xpose.msk.msra.mxu1 %vm623_vm5, %v2067_v31  ;;  %v3928_v26 = vld [vmem:[#allocation36_spill] sm:$0xff]  ;;  %v3933_v31 = vld [vmem:[#allocation31_spill] sm:$0xff] }
 0x18a   :  { %1496 = vmatpush.xpose.msk.msra.mxu0 %vm623_vm5, %v2055_v29  ;;  %v3931_v29 = vld [vmem:[#allocation35_spill] sm:$0xff] }
 0x18c   :  { %1530 = vmatpush.xpose.msk.msra.mxu2 %vm623_vm5, %v2050_v28  ;;  %v3930_v28 = vld [vmem:[#allocation32_spill] sm:$0xff] }
 0x18d   :  { %1547 = vmatpush.xpose.msk.msra.mxu3 %vm623_vm5, %v2062_v30  ;;  %1514 = vmatpush.xpose.msk.msra.mxu1 %vm623_vm5, %v2091_v35  ;;  %v3932_v30 = vld [vmem:[#allocation41_spill] sm:$0xff]  ;;  %v3937_v35 = vld [vmem:[#allocation34_spill] sm:$0xff] }
 0x18e   :  { %1497 = vmatpush.xpose.msk.msra.mxu0 %vm623_vm5, %v2079_v33  ;;  %v3935_v33 = vld [vmem:[#allocation38_spill] sm:$0xff] }
 0x190   :  { %1531 = vmatpush.xpose.msk.msra.mxu2 %vm623_vm5, %v2074_v32  ;;  %v3934_v32 = vld [vmem:[#allocation37_spill] sm:$0xff] }
 0x191   :  { %1548 = vmatpush.xpose.msk.msra.mxu3 %vm623_vm5, %v2086_v34  ;;  %1515 = vmatpush.xpose.msk.msra.mxu1 %vm623_vm5, %v2115_v39  ;;  %v3936_v34 = vld [vmem:[#allocation43_spill] sm:$0xff]  ;;  %v3941_v39 = vld [vmem:[#allocation40_spill] sm:$0xff] }
 0x192   :  { %1498 = vmatpush.xpose.msk.msra.mxu0 %vm623_vm5, %v2103_v37  ;;  %v3939_v37 = vld [vmem:[#allocation42_spill] sm:$0xff] }
 0x194   :  { %1532 = vmatpush.xpose.msk.msra.mxu2 %vm623_vm5, %v2098_v36  ;;  %v3938_v36 = vld [vmem:[#allocation39_spill] sm:$0xff] }
 0x195   :  { %1549 = vmatpush.xpose.msk.msra.mxu3 %vm623_vm5, %v2110_v38  ;;  %1516 = vmatpush.xpose.msk.msra.mxu1 %vm623_vm5, %v3853_v0  ;;  %v3940_v38 = vld [vmem:[#allocation47_spill] sm:$0xff]  ;;  %v3943_v0 = vld [vmem:[#allocation46_spill] sm:$0xff] }
 0x196   :  { %1499 = vmatpush.xpose.msk.msra.mxu0 %vm623_vm5, %v2127_v41  ;;  %v3942_v41 = vld [vmem:[#allocation45_spill] sm:$0xff] }
 0x198   :  { %1533 = vmatpush.xpose.msk.msra.mxu2 %vm623_vm5, %v3854_v1  ;;  %v3944_v1 = vld [vmem:[#allocation51_spill] sm:$0xff] }
 0x199   :  { %1550 = vmatpush.xpose.msk.msra.mxu3 %vm623_vm5, %v3855_v2  ;;  %1517 = vmatpush.xpose.msk.msra.mxu1 %vm623_vm5, %v3857_v4  ;;  %v3945_v2 = vld [vmem:[#allocation44_spill] sm:$0xff]  ;;  %v3947_v4 = vld [vmem:[#allocation50_spill] sm:$0xff] }
 0x19a   :  { %1500 = vmatpush.xpose.msk.msra.mxu0 %vm623_vm5, %v3856_v3  ;;  %v3946_v3 = vld [vmem:[#allocation49_spill] sm:$0xff] }
 0x19c   :  { %1534 = vmatpush.xpose.msk.msra.mxu2 %vm623_vm5, %v3858_v5  ;;  %v3948_v5 = vld [vmem:[#allocation55_spill] sm:$0xff] }
 0x19d   :  { %1551 = vmatpush.xpose.msk.msra.mxu3 %vm623_vm5, %v3859_v6  ;;  %1518 = vmatpush.xpose.msk.msra.mxu1 %vm623_vm5, %v3861_v8  ;;  %v3949_v6 = vld [vmem:[#allocation48_spill] sm:$0xff]  ;;  %v3951_v8 = vld [vmem:[#allocation54_spill] sm:$0xff] }
 0x19e   :  { %1501 = vmatpush.xpose.msk.msra.mxu0 %vm623_vm5, %v3860_v7  ;;  %v3950_v7 = vld [vmem:[#allocation53_spill] sm:$0xff] }
 0x1a0   :  { %1535 = vmatpush.xpose.msk.msra.mxu2 %vm623_vm5, %v3862_v10  ;;  %v3952_v10 = vld [vmem:[#allocation59_spill] sm:$0xff] }
 0x1a1   :  { %1552 = vmatpush.xpose.msk.msra.mxu3 %vm623_vm5, %v3863_v11  ;;  %1519 = vmatpush.xpose.msk.msra.mxu1 %vm623_vm5, %v3924_v22  ;;  %v3953_v11 = vld [vmem:[#allocation52_spill] sm:$0xff]  ;;  %v3962_v22 = vld [vmem:[#allocation75_spill] sm:$0xff] }
 0x1a2   :  { %1502 = vmatpush.xpose.msk.msra.mxu0 %vm623_vm5, %v3923_v21  ;;  %v3960_v21 = vld [vmem:[#allocation65_spill] sm:$0xff] }
 0x1a4   :  { %1536 = vmatpush.xpose.msk.msra.mxu2 %vm623_vm5, %v3925_v23  ;;  %v3964_v23 = vld [vmem:[#allocation73_spill] sm:$0xff] }
 0x1a5   :  { %1553 = vmatpush.xpose.msk.msra.mxu3 %vm623_vm5, %v3926_v24  ;;  %1520 = vmatpush.xpose.msk.msra.mxu1 %vm623_vm5, %v3928_v26  ;;  %v3968_v24 = vld [vmem:[#allocation77_spill] sm:$0xff]  ;;  %v3971_v26 = vld [vmem:[#allocation76_spill] sm:$0xff] }
 0x1a6   :  { %1503 = vmatpush.xpose.msk.msra.mxu0 %vm623_vm5, %v3927_v25  ;;  %v3970_v25 = vld [vmem:[#allocation83_spill] sm:$0xff] }
 0x1a8   :  { %1537 = vmatpush.xpose.msk.msra.mxu2 %vm623_vm5, %v3929_v27  ;;  %v3972_v27 = vld [vmem:[#allocation81_spill] sm:$0xff] }
 0x1a9   :  { %1554 = vmatpush.xpose.msk.msra.mxu3 %vm623_vm5, %v3930_v28  ;;  %1521 = vmatpush.xpose.msk.msra.mxu1 %vm623_vm5, %v3932_v30  ;;  %v3973_v28 = vld [vmem:[#allocation82_spill] sm:$0xff]  ;;  %v3975_v30 = vld [vmem:[#allocation80_spill] sm:$0xff] }
 0x1aa   :  { %1504 = vmatpush.xpose.msk.msra.mxu0 %vm623_vm5, %v3931_v29  ;;  %v3974_v29 = vld [vmem:[#allocation87_spill] sm:$0xff] }
 0x1ac   :  { %1538 = vmatpush.xpose.msk.msra.mxu2 %vm623_vm5, %v3933_v31  ;;  %v3976_v31 = vld [vmem:[#allocation85_spill] sm:$0xff] }
 0x1ad   :  { %1555 = vmatpush.xpose.msk.msra.mxu3 %vm623_vm5, %v3934_v32  ;;  %1574 = vmatpush.xpose.msk.msrb.mxu1 %vm623_vm5, %v3936_v34  ;;  %v3977_v32 = vld [vmem:[#allocation86_spill] sm:$0xff]  ;;  %v3979_v34 = vld [vmem:[#allocation84_spill] sm:$0xff] }
 0x1ae   :  { %1557 = vmatpush.xpose.msk.msrb.mxu0 %vm623_vm5, %v3935_v33  ;;  %v3978_v33 = vld [vmem:[#allocation91_spill] sm:$0xff] }
 0x1b0   :  { %1591 = vmatpush.xpose.msk.msrb.mxu2 %vm623_vm5, %v3937_v35  ;;  %v3980_v35 = vld [vmem:[#allocation89_spill] sm:$0xff] }
 0x1b1   :  { %1608 = vmatpush.xpose.msk.msrb.mxu3 %vm623_vm5, %v3938_v36  ;;  %1575 = vmatpush.xpose.msk.msrb.mxu1 %vm623_vm5, %v3940_v38  ;;  %v3981_v36 = vld [vmem:[#allocation90_spill] sm:$0xff]  ;;  %v3983_v38 = vld [vmem:[#allocation88_spill] sm:$0xff] }
 0x1b2   :  { %1558 = vmatpush.xpose.msk.msrb.mxu0 %vm623_vm5, %v3939_v37  ;;  %v3982_v37 = vld [vmem:[#allocation95_spill] sm:$0xff] }
 0x1b4   :  { %1592 = vmatpush.xpose.msk.msrb.mxu2 %vm623_vm5, %v3941_v39  ;;  %v3984_v39 = vld [vmem:[#allocation93_spill] sm:$0xff] }
 0x1b5   :  { %1609 = vmatpush.xpose.msk.msrb.mxu3 %vm623_vm5, %v3942_v41  ;;  %1576 = vmatpush.xpose.msk.msrb.mxu1 %vm623_vm5, %v3944_v1  ;;  %v3985_v41 = vld [vmem:[#allocation94_spill] sm:$0xff]  ;;  %v3987_v1 = vld [vmem:[#allocation92_spill] sm:$0xff] }
 0x1b6   :  { %1559 = vmatpush.xpose.msk.msrb.mxu0 %vm623_vm5, %v3943_v0  ;;  %v3986_v0 = vld [vmem:[#allocation99_spill] sm:$0xff] }
 0x1b8   :  { %1593 = vmatpush.xpose.msk.msrb.mxu2 %vm623_vm5, %v3945_v2  ;;  %v3988_v2 = vld [vmem:[#allocation97_spill] sm:$0xff] }
 0x1b9   :  { %1610 = vmatpush.xpose.msk.msrb.mxu3 %vm623_vm5, %v3946_v3  ;;  %1577 = vmatpush.xpose.msk.msrb.mxu1 %vm623_vm5, %v3948_v5  ;;  %v3989_v3 = vld [vmem:[#allocation98_spill] sm:$0xff]  ;;  %v3991_v5 = vld [vmem:[#allocation96_spill] sm:$0xff] }
 0x1ba   :  { %1560 = vmatpush.xpose.msk.msrb.mxu0 %vm623_vm5, %v3947_v4  ;;  %v3990_v4 = vld [vmem:[#allocation101_spill] sm:$0xff] }
 0x1bc   :  { %1594 = vmatpush.xpose.msk.msrb.mxu2 %vm623_vm5, %v3949_v6  ;;  %v3992_v6 = vld [vmem:[#allocation100_spill] sm:$0xff] }
 0x1bd   :  { %1611 = vmatpush.xpose.msk.msrb.mxu3 %vm623_vm5, %v3950_v7  ;;  %1578 = vmatpush.xpose.msk.msrb.mxu1 %vm623_vm5, %v3952_v10 }
 0x1be   :  { %1561 = vmatpush.xpose.msk.msrb.mxu0 %vm623_vm5, %v3951_v8 }
 0x1c0   :  { %1595 = vmatpush.xpose.msk.msrb.mxu2 %vm623_vm5, %v3953_v11 }
 0x1c1   :  { %1612 = vmatpush.xpose.msk.msrb.mxu3 %vm623_vm5, %v3954_v55 }
 0x1c2   :  { %1562 = vmatpush.xpose.msk.msrb.mxu0 %vm623_vm5, %v3955_v42 }
 0x1c4   :  { %1596 = vmatpush.xpose.msk.msrb.mxu2 %vm623_vm5, %v3898_v14  ;;  %v3961_v14 = vld [vmem:[#allocation69_spill] sm:$0xff] }
 0x1c8   :  { %1597 = vmatpush.xpose.msk.msrb.mxu2 %vm623_vm5, %v3902_v18  ;;  %v3963_v18 = vld [vmem:[#allocation68_spill] sm:$0xff] }
 0x1cc   :  { %1598 = vmatpush.xpose.msk.msrb.mxu2 %vm623_vm5, %v3906_v56  ;;  %v3967_v56 = vld [vmem:[#allocation72_spill] sm:$0xff] }
 0x1d0   :  { %1599 = vmatpush.xpose.msk.msrb.mxu2 %vm623_vm5, %v3963_v18 }
 0x1d4   :  { %1600 = vmatpush.xpose.msk.msrb.mxu2 %vm623_vm5, %v3967_v56 }
 0x1d8   :  { %1601 = vmatpush.xpose.msk.msrb.mxu2 %vm623_vm5, %v3971_v26  ;;  %v1690_v26 = vld [vmem:[%s3598_s2 + $0x28] sm:$0xff] }
 0x1dc   :  { %1602 = vmatpush.xpose.msk.msrb.mxu2 %vm623_vm5, %v3975_v30  ;;  %v1694_v30 = vld [vmem:[%s3598_s2 + $0x20] sm:$0xff] }
 0x1e0   :  { %1603 = vmatpush.xpose.msk.msrb.mxu2 %vm623_vm5, %v3979_v34  ;;  %v1698_v34 = vld [vmem:[%s3598_s2 + $0x18] sm:$0xff] }
 0x1e4   :  { %1604 = vmatpush.xpose.msk.msrb.mxu2 %vm623_vm5, %v3983_v38  ;;  %v1702_v38 = vld [vmem:[%s3598_s2 + $0x10] sm:$0xff] }
 0x1e8   :  { %1605 = vmatpush.xpose.msk.msrb.mxu2 %vm623_vm5, %v3987_v1  ;;  %v1706_v1 = vld [vmem:[%s3598_s2 + $0x8] sm:$0xff] }
 0x1ec   :  { %1606 = vmatpush.xpose.msk.msrb.mxu2 %vm623_vm5, %v3991_v5  ;;  %v1710_v5 = vld [vmem:[%s3598_s2] sm:$0xff] }
 0x1f3   :  { %v600_v61 = vpop.xlane.xlu1 %599 }
 0x1f4   :  { %v601_v50 = vsub.f32 %v597_v53, %v600_v61  ;;  %v3956_v61 = vld [vmem:[#allocation63_spill] sm:$0xff] }
 0x1f5   :  { %1579 = vmatpush.xpose.msk.msrb.mxu1 %vm623_vm5, %v3956_v61 }
 0x1f6   :  { %v602_v63 = vmul.f32 1.442695, %v601_v50  ;;  %v3957_v50 = vld [vmem:[#allocation61_spill] sm:$0xff] }
 0x1f7   :  { %1613 = vmatpush.xpose.msk.msrb.mxu3 %vm623_vm5, %v3957_v50 }
 0x1f8   :  { %1636 = vpow2.f32 %v602_v63  ;;  %v3958_v63 = vld [vmem:[#allocation62_spill] sm:$0xff] }
 0x1f9   :  { %1563 = vmatpush.xpose.msk.msrb.mxu0 %vm623_vm5, %v3958_v63 }
 0x1fb   :  { %1614 = vmatpush.xpose.msk.msrb.mxu3 %vm623_vm5, %v3960_v21  ;;  %v347_v7 = vpop.xlane.xlu1 %346 }
 0x1fc   :  { %1638 = vlog2.f32 %v347_v7  ;;  %v1712_v7 = vld [vmem:[%s3598_s2 + $0x100] sm:$0xff] }
 0x1fd   :  { %1564 = vmatpush.xpose.msk.msrb.mxu0 %vm623_vm5, %v3904_v45  ;;  %v3965_v45 = vld [vmem:[#allocation74_spill] sm:$0xff] }
 0x1fe   :  { %v2978_v53 = vpop.eup %1636 }
 0x1ff   :  { %v604_v19 = vsel %vm338_vm4, %v2978_v53, 0.0  ;;  %1615 = vmatpush.xpose.msk.msrb.mxu3 %vm623_vm5, %v3961_v14 }
 0x200   :  { %605 = vadd.xlane.f32.xlu2 %v604_v19  ;;  %v3959_v19 = vld [vmem:[#allocation67_spill] sm:$0xff] }
 0x201   :  { %1580 = vmatpush.xpose.msk.msrb.mxu1 %vm623_vm5, %v3959_v19  ;;  %1565 = vmatpush.xpose.msk.msrb.mxu0 %vm623_vm5, %v3908_v12  ;;  %v3969_v12 = vld [vmem:[#allocation78_spill] sm:$0xff] }
 0x202   :  { %v1639_v8 = vpop.eup %1638 }
 0x203   :  { %1616 = vmatpush.xpose.msk.msrb.mxu3 %vm623_vm5, %v3964_v23  ;;  %v349_v11 = vmul.f32 0.6931472, %v1639_v8  ;;  %v1713_v8 = vld [vmem:[%s3598_s2 + $0x180] sm:$0xff] }
 0x205   :  { %1581 = vmatpush.xpose.msk.msrb.mxu1 %vm623_vm5, %v3905_v49  ;;  %1566 = vmatpush.xpose.msk.msrb.mxu0 %vm623_vm5, %v3965_v45  ;;  %v3966_v49 = vld [vmem:[#allocation79_spill] sm:$0xff]  ;;  %v3204_v55 = vsub.f32 %v2847_v52, %v349_v11  ;;  %v1715_v11 = vld [vmem:[%s3598_s2 + $0x2f8] sm:$0xff] }
 0x207   :  { %1617 = vmatpush.xpose.msk.msrb.mxu3 %vm623_vm5, %v3968_v24  ;;  %v351_v50 = vmul.f32 1.442695, %v3204_v55  ;;  %v1687_v24 = vld [vmem:[%s3598_s2 + $0xb0] sm:$0xff] }
 0x209   :  { %1582 = vmatpush.xpose.msk.msrb.mxu1 %vm623_vm5, %v3962_v22  ;;  %1567 = vmatpush.xpose.msk.msrb.mxu0 %vm623_vm5, %v3969_v12  ;;  %v1688_v12 = vld [vmem:[%s3598_s2 + $0x130] sm:$0xff] }
 0x20b   :  { %1618 = vmatpush.xpose.msk.msrb.mxu3 %vm623_vm5, %v3972_v27  ;;  %v1691_v27 = vld [vmem:[%s3598_s2 + $0xa8] sm:$0xff] }
 0x20d   :  { %1583 = vmatpush.xpose.msk.msrb.mxu1 %vm623_vm5, %v3966_v49  ;;  %1568 = vmatpush.xpose.msk.msrb.mxu0 %vm623_vm5, %v3973_v28  ;;  %v1692_v28 = vld [vmem:[%s3598_s2 + $0x128] sm:$0xff] }
 0x20f   :  { %1619 = vmatpush.xpose.msk.msrb.mxu3 %vm623_vm5, %v3976_v31  ;;  %v1695_v31 = vld [vmem:[%s3598_s2 + $0xa0] sm:$0xff] }
 0x211   :  { %1584 = vmatpush.xpose.msk.msrb.mxu1 %vm623_vm5, %v3970_v25  ;;  %1569 = vmatpush.xpose.msk.msrb.mxu0 %vm623_vm5, %v3977_v32  ;;  %v1689_v25 = vld [vmem:[%s3598_s2 + $0x1b0] sm:$0xff]  ;;  %v1696_v32 = vld [vmem:[%s3598_s2 + $0x120] sm:$0xff] }
 0x213   :  { %1620 = vmatpush.xpose.msk.msrb.mxu3 %vm623_vm5, %v3980_v35  ;;  %v1699_v35 = vld [vmem:[%s3598_s2 + $0x98] sm:$0xff] }
 0x215   :  { %1585 = vmatpush.xpose.msk.msrb.mxu1 %vm623_vm5, %v3974_v29  ;;  %1570 = vmatpush.xpose.msk.msrb.mxu0 %vm623_vm5, %v3981_v36  ;;  %v1693_v29 = vld [vmem:[%s3598_s2 + $0x1a8] sm:$0xff]  ;;  %v1700_v36 = vld [vmem:[%s3598_s2 + $0x118] sm:$0xff] }
 0x217   :  { %1621 = vmatpush.xpose.msk.msrb.mxu3 %vm623_vm5, %v3984_v39  ;;  %v1703_v39 = vld [vmem:[%s3598_s2 + $0x90] sm:$0xff] }
 0x219   :  { %1586 = vmatpush.xpose.msk.msrb.mxu1 %vm623_vm5, %v3978_v33  ;;  %1571 = vmatpush.xpose.msk.msrb.mxu0 %vm623_vm5, %v3985_v41  ;;  %v1697_v33 = vld [vmem:[%s3598_s2 + $0x1a0] sm:$0xff]  ;;  %v1704_v41 = vld [vmem:[%s3598_s2 + $0x110] sm:$0xff] }
 0x21b   :  { %1622 = vmatpush.xpose.msk.msrb.mxu3 %vm623_vm5, %v3988_v2  ;;  %v1707_v2 = vld [vmem:[%s3598_s2 + $0x88] sm:$0xff] }
 0x21d   :  { %1587 = vmatpush.xpose.msk.msrb.mxu1 %vm623_vm5, %v3982_v37  ;;  %1572 = vmatpush.xpose.msk.msrb.mxu0 %vm623_vm5, %v3989_v3  ;;  %v1701_v37 = vld [vmem:[%s3598_s2 + $0x198] sm:$0xff]  ;;  %v1708_v3 = vld [vmem:[%s3598_s2 + $0x108] sm:$0xff] }
 0x21f   :  { %1623 = vmatpush.xpose.msk.msrb.mxu3 %vm623_vm5, %v3992_v6  ;;  %v1711_v6 = vld [vmem:[%s3598_s2 + $0x80] sm:$0xff] }
 0x221   :  { %1588 = vmatpush.xpose.msk.msrb.mxu1 %vm623_vm5, %v3986_v0  ;;  %v1705_v0 = vld [vmem:[%s3598_s2 + $0x190] sm:$0xff] }
 0x225   :  { %1589 = vmatpush.xpose.msk.msrb.mxu1 %vm623_vm5, %v3990_v4  ;;  %v1709_v4 = vld [vmem:[%s3598_s2 + $0x188] sm:$0xff] }
 0x273   :  { %v606_v10 = vpop.xlane.xlu2 %605 }
 0x274   :  { %1640 = vrcp.f32 %v606_v10  ;;  %v618_v19 = vand.u32 2147483648, %v606_v10  ;;  %v616_v14 = vand.u32 2147483647, %v606_v10  ;;  %vm612_vm7 = vweird.f32 %v606_v10 }
 0x275   :  { %1642 = vpow2.f32 %v351_v50  ;;  %v1718_v50 = vld [vmem:[%s3598_s2 + $0x270] sm:$0xff] }
 0x276   :  { %v619_v18 = vor.u32 1.1754944e-38, %v618_v19  ;;  %vm617_vm9 = vcmp.eq.f32.partialorder %v616_v14, 8.507059e+37  ;;  %v1720_v19 = vld [vmem:[%s3598_s2 + $0x370] sm:$0xff]  ;;  %v1722_v14 = vld [vmem:[%s3598_s2 + $0x268] sm:$0xff] }
 0x27a   :  { %v1641_v42 = vpop.eup %1640 }
 0x27b   :  { %v608_v61 = vmul.f32 %v1641_v42, %v606_v10  ;;  %vm613_vm6 = vweird.f32 %v1641_v42  ;;  %v3208_v49 = vpop.eup %1642  ;;  %v1714_v10 = vld [vmem:[%s3598_s2 + $0x278] sm:$0xff] }
 0x27c   :  { %vm614_vm8 = vmor %vm612_vm7, %vm613_vm6 }
 0x27d   :  { %v609_v63 = vsub.f32 1.0, %v608_v61  ;;  %v1717_v61 = vld [vmem:[%s3598_s2 + $0x3f8] sm:$0xff] }
 0x27f   :  { %v610_v21 = vmul.f32 %v1641_v42, %v609_v63  ;;  %v1719_v63 = vld [vmem:[%s3598_s2 + $0x2f0] sm:$0xff] }
 0x281   :  { %v611_v22 = vadd.f32 %v1641_v42, %v610_v21  ;;  %v1721_v21 = vld [vmem:[%s3598_s2 + $0x3f0] sm:$0xff] }
 0x283   :  { %v615_v23 = vsel %vm614_vm8, %v1641_v42, %v611_v22  ;;  %v1716_v42 = vld [vmem:[%s3598_s2 + $0x378] sm:$0xff]  ;;  %v1723_v22 = vld [vmem:[%s3598_s2 + $0x2e8] sm:$0xff] }
 0x284   :  { %v620_v45 = vsel %vm617_vm9, %v619_v18, %v615_v23  ;;  %v1724_v18 = vld [vmem:[%s3598_s2 + $0x368] sm:$0xff] }
 0x285   :  { %v621_v52 = vmul.f32 %v2978_v53, %v620_v45  ;;  %v1668_v53 = vld [vmem:[%s3598_s2 + $0xf0] sm:$0xff]  ;;  %v1725_v23 = vld [vmem:[%s3598_s2 + $0x3e8] sm:$0xff]  ;;  %v1726_v45 = vld [vmem:[%s3598_s2 + $0x260] sm:$0xff] }
 0x287   :  { %v622_v56 = vsub.f32 %v621_v52, %v3208_v49  ;;  %v1727_v52 = vld [vmem:[%s3598_s2 + $0x2e0] sm:$0xff] }
 0x289   :  { %1505 = vmatmul.msk.f32.vlgmr.msra.gmra.mxu0 %vm623_vm5, %v622_v56  ;;  %1522 = vmatmul.msk.f32.vlgmr.msra.gmra.mxu1 %vm623_vm5, %v622_v56 }
 0x28a   :  { %1539 = vmatmul.msk.f32.vlgmr.msra.gmra.mxu2 %vm623_vm5, %v622_v56  ;;  %1556 = vmatmul.msk.f32.vlgmr.msra.gmra.mxu3 %vm623_vm5, %v622_v56 }
 0x28b   :  { %1253 = vmatpush.msra.mxu0 %v2856_v15  ;;  %1273 = vmatpush.msra.mxu1 %v2863_v16  ;;  %v1669_v15 = vld [vmem:[%s3598_s2 + $0xe8] sm:$0xff]  ;;  %v1670_v16 = vld [vmem:[%s3598_s2 + $0xd8] sm:$0xff] }
 0x28c   :  { %1293 = vmatpush.msra.mxu2 %v2870_v17  ;;  %1313 = vmatpush.msra.mxu3 %v2877_v20  ;;  %v1671_v17 = vld [vmem:[%s3598_s2 + $0x50] sm:$0xff] }
 0x28d   :  { %1254 = vmatpush.msra.mxu0 %v2884_v58  ;;  %1274 = vmatpush.msra.mxu1 %v1668_v53  ;;  %v1672_v20 = vld [vmem:[%s3598_s2 + $0xd0] sm:$0xff]  ;;  %v1729_v53 = vld [vmem:[%s3598_s2 + $0x3e0] sm:$0xff] }
 0x28e   :  { %1294 = vmatpush.msra.mxu2 %v2893_v57  ;;  %1314 = vmatpush.msra.mxu3 %v2900_v47  ;;  %v1673_v58 = vld [vmem:[%s3598_s2 + $0x1d0] sm:$0xff]  ;;  %v1674_v57 = vld [vmem:[%s3598_s2 + $0x48] sm:$0xff] }
 0x28f   :  { %1255 = vmatpush.msra.mxu0 %v2907_v9  ;;  %1275 = vmatpush.msra.mxu1 %v1669_v15  ;;  %v1675_v47 = vld [vmem:[%s3598_s2 + $0xc8] sm:$0xff]  ;;  %v1730_v15 = vld [vmem:[%s3598_s2 + $0x258] sm:$0xff] }
 0x290   :  { %1295 = vmatpush.msra.mxu2 %v2916_v59  ;;  %1315 = vmatpush.msra.mxu3 %v2923_v40  ;;  %v1676_v9 = vld [vmem:[%s3598_s2 + $0x148] sm:$0xff]  ;;  %v1678_v40 = vld [vmem:[%s3598_s2 + $0x40] sm:$0xff] }
 0x291   :  { %1573 = vmatmul.msk.f32.vlgmr.msrb.gmra.mxu0 %vm623_vm5, %v622_v56  ;;  %1590 = vmatmul.msk.f32.vlgmr.msrb.gmra.mxu1 %vm623_vm5, %v622_v56  ;;  %v1677_v59 = vld [vmem:[%s3598_s2 + $0x1c8] sm:$0xff] }
 0x292   :  { %1607 = vmatmul.msk.f32.vlgmr.msrb.gmra.mxu2 %vm623_vm5, %v622_v56  ;;  %1624 = vmatmul.msk.f32.vlgmr.msrb.gmra.mxu3 %vm623_vm5, %v622_v56  ;;  %v1728_v56 = vld [vmem:[%s3598_s2 + $0x360] sm:$0xff] }
 0x293   :  { %1256 = vmatpush.msra.mxu0 %v2930_v13  ;;  %1276 = vmatpush.msra.mxu1 %v2937_v62  ;;  %v1679_v13 = vld [vmem:[%s3598_s2 + $0xc0] sm:$0xff] }
 0x294   :  { %1296 = vmatpush.msra.mxu2 %v2944_v46  ;;  %1316 = vmatpush.msra.mxu3 %v2951_v60  ;;  %v1680_v62 = vld [vmem:[%s3598_s2 + $0x140] sm:$0xff]  ;;  %v1682_v60 = vld [vmem:[%s3598_s2 + $0x38] sm:$0xff] }
 0x295   :  { %1257 = vmatpush.msra.mxu0 %v2958_v51  ;;  %1277 = vmatpush.msra.mxu1 %v1670_v16  ;;  %v1681_v46 = vld [vmem:[%s3598_s2 + $0x1c0] sm:$0xff]  ;;  %v1683_v51 = vld [vmem:[%s3598_s2 + $0xb8] sm:$0xff] }
 0x296   :  { %1297 = vmatpush.msra.mxu2 %v2967_v43  ;;  %1317 = vmatpush.msra.mxu3 %v2974_v44  ;;  %v1684_v43 = vld [vmem:[%s3598_s2 + $0x138] sm:$0xff] }
 0x297   :  { %1258 = vmatpush.msra.mxu0 %v1671_v17  ;;  %1278 = vmatpush.msra.mxu1 %v1672_v20  ;;  %v1685_v44 = vld [vmem:[%s3598_s2 + $0x1b8] sm:$0xff] }
 0x298   :  { %1298 = vmatpush.msra.mxu2 %v2989_v54  ;;  %1318 = vmatpush.msra.mxu3 %v1673_v58  ;;  %v1686_v54 = vld [vmem:[%s3598_s2 + $0x30] sm:$0xff]  ;;  %v1731_v16 = vld [vmem:[%s3598_s2 + $0x2d8] sm:$0xff] }
 0x299   :  { %1259 = vmatpush.msra.mxu0 %v1674_v57  ;;  %1279 = vmatpush.msra.mxu1 %v1675_v47  ;;  %v1732_v17 = vld [vmem:[%s3598_s2 + $0x358] sm:$0xff]  ;;  %v1734_v58 = vld [vmem:[%s3598_s2 + $0x250] sm:$0xff] }
 0x29a   :  { %1299 = vmatpush.msra.mxu2 %v1676_v9  ;;  %1319 = vmatpush.msra.mxu3 %v1677_v59  ;;  %v1733_v20 = vld [vmem:[%s3598_s2 + $0x3d8] sm:$0xff]  ;;  %v1735_v57 = vld [vmem:[%s3598_s2 + $0x2d0] sm:$0xff]  ;;  %v1738_v59 = vld [vmem:[%s3598_s2 + $0x248] sm:$0xff] }
 0x29b   :  { %1260 = vmatpush.msra.mxu0 %v1678_v40  ;;  %1280 = vmatpush.msra.mxu1 %v1679_v13  ;;  %v1736_v47 = vld [vmem:[%s3598_s2 + $0x350] sm:$0xff]  ;;  %v1739_v40 = vld [vmem:[%s3598_s2 + $0x2c8] sm:$0xff] }
 0x29c   :  { %1300 = vmatpush.msra.mxu2 %v1680_v62  ;;  %1320 = vmatpush.msra.mxu3 %v1681_v46  ;;  %v1737_v9 = vld [vmem:[%s3598_s2 + $0x3d0] sm:$0xff]  ;;  %v1740_v13 = vld [vmem:[%s3598_s2 + $0x348] sm:$0xff]  ;;  %v1742_v46 = vld [vmem:[%s3598_s2 + $0x240] sm:$0xff] }
 0x29d   :  { %1261 = vmatpush.msra.mxu0 %v1682_v60  ;;  %1281 = vmatpush.msra.mxu1 %v1683_v51  ;;  %v1741_v62 = vld [vmem:[%s3598_s2 + $0x3c8] sm:$0xff]  ;;  %v1743_v60 = vld [vmem:[%s3598_s2 + $0x2c0] sm:$0xff] }
 0x29e   :  { %1301 = vmatpush.msra.mxu2 %v1684_v43  ;;  %1321 = vmatpush.msra.mxu3 %v1685_v44  ;;  %v1744_v51 = vld [vmem:[%s3598_s2 + $0x340] sm:$0xff]  ;;  %v1746_v44 = vld [vmem:[%s3598_s2 + $0x238] sm:$0xff] }
 0x29f   :  { %1262 = vmatpush.msra.mxu0 %v1686_v54  ;;  %1282 = vmatpush.msra.mxu1 %v1687_v24  ;;  %v1745_v43 = vld [vmem:[%s3598_s2 + $0x3c0] sm:$0xff]  ;;  %v1747_v54 = vld [vmem:[%s3598_s2 + $0x2b8] sm:$0xff] }
 0x2a0   :  { %1302 = vmatpush.msra.mxu2 %v1688_v12  ;;  %1322 = vmatpush.msra.mxu3 %v1689_v25  ;;  %v1748_v24 = vld [vmem:[%s3598_s2 + $0x338] sm:$0xff]  ;;  %v1750_v25 = vld [vmem:[%s3598_s2 + $0x230] sm:$0xff] }
 0x2a1   :  { %1263 = vmatpush.msra.mxu0 %v1690_v26  ;;  %1283 = vmatpush.msra.mxu1 %v1691_v27  ;;  %v1749_v12 = vld [vmem:[%s3598_s2 + $0x3b8] sm:$0xff]  ;;  %v1751_v26 = vld [vmem:[%s3598_s2 + $0x2b0] sm:$0xff] }
 0x2a2   :  { %1303 = vmatpush.msra.mxu2 %v1692_v28  ;;  %1323 = vmatpush.msra.mxu3 %v1693_v29  ;;  %v1752_v27 = vld [vmem:[%s3598_s2 + $0x330] sm:$0xff]  ;;  %v1754_v29 = vld [vmem:[%s3598_s2 + $0x228] sm:$0xff] }
 0x2a3   :  { %1264 = vmatpush.msra.mxu0 %v1694_v30  ;;  %1284 = vmatpush.msra.mxu1 %v1695_v31  ;;  %v1753_v28 = vld [vmem:[%s3598_s2 + $0x3b0] sm:$0xff]  ;;  %v1755_v30 = vld [vmem:[%s3598_s2 + $0x2a8] sm:$0xff] }
 0x2a4   :  { %1304 = vmatpush.msra.mxu2 %v1696_v32  ;;  %1324 = vmatpush.msra.mxu3 %v1697_v33  ;;  %v1756_v31 = vld [vmem:[%s3598_s2 + $0x328] sm:$0xff]  ;;  %v1758_v33 = vld [vmem:[%s3598_s2 + $0x220] sm:$0xff] }
 0x2a5   :  { %1265 = vmatpush.msra.mxu0 %v1698_v34  ;;  %1285 = vmatpush.msra.mxu1 %v1699_v35  ;;  %v1757_v32 = vld [vmem:[%s3598_s2 + $0x3a8] sm:$0xff]  ;;  %v1759_v34 = vld [vmem:[%s3598_s2 + $0x2a0] sm:$0xff] }
 0x2a6   :  { %1305 = vmatpush.msra.mxu2 %v1700_v36  ;;  %1325 = vmatpush.msra.mxu3 %v1701_v37  ;;  %v1760_v35 = vld [vmem:[%s3598_s2 + $0x320] sm:$0xff]  ;;  %v1762_v37 = vld [vmem:[%s3598_s2 + $0x218] sm:$0xff] }
 0x2a7   :  { %1266 = vmatpush.msra.mxu0 %v1702_v38  ;;  %1286 = vmatpush.msra.mxu1 %v1703_v39  ;;  %v1761_v36 = vld [vmem:[%s3598_s2 + $0x3a0] sm:$0xff]  ;;  %v1763_v38 = vld [vmem:[%s3598_s2 + $0x298] sm:$0xff] }
 0x2a8   :  { %1306 = vmatpush.msra.mxu2 %v1704_v41  ;;  %1326 = vmatpush.msra.mxu3 %v1705_v0  ;;  %v1764_v39 = vld [vmem:[%s3598_s2 + $0x318] sm:$0xff]  ;;  %v1766_v0 = vld [vmem:[%s3598_s2 + $0x210] sm:$0xff] }
 0x2a9   :  { %1267 = vmatpush.msra.mxu0 %v1706_v1  ;;  %1287 = vmatpush.msra.mxu1 %v1707_v2  ;;  %v1765_v41 = vld [vmem:[%s3598_s2 + $0x398] sm:$0xff]  ;;  %v1767_v1 = vld [vmem:[%s3598_s2 + $0x290] sm:$0xff] }
 0x2aa   :  { %1307 = vmatpush.msra.mxu2 %v1708_v3  ;;  %1327 = vmatpush.msra.mxu3 %v1709_v4  ;;  %v1768_v2 = vld [vmem:[%s3598_s2 + $0x310] sm:$0xff]  ;;  %v1770_v4 = vld [vmem:[%s3598_s2 + $0x208] sm:$0xff] }
 0x2ab   :  { %1268 = vmatpush.msra.mxu0 %v1710_v5  ;;  %1288 = vmatpush.msra.mxu1 %v1711_v6  ;;  %v1769_v3 = vld [vmem:[%s3598_s2 + $0x390] sm:$0xff]  ;;  %v1771_v5 = vld [vmem:[%s3598_s2 + $0x288] sm:$0xff] }
 0x2ac   :  { %1308 = vmatpush.msra.mxu2 %v1712_v7  ;;  %1328 = vmatpush.msra.mxu3 %v1713_v8  ;;  %v1772_v6 = vld [vmem:[%s3598_s2 + $0x308] sm:$0xff]  ;;  %v1774_v8 = vld [vmem:[%s3598_s2 + $0x200] sm:$0xff] }
 0x2ad   :  { %1333 = vmatpush.msrb.mxu0 %v1714_v10  ;;  %1353 = vmatpush.msrb.mxu1 %v1715_v11  ;;  %v1773_v7 = vld [vmem:[%s3598_s2 + $0x388] sm:$0xff]  ;;  %v1775_v10 = vld [vmem:[%s3598_s2 + $0x280] sm:$0xff] }
 0x2ae   :  { %1373 = vmatpush.msrb.mxu2 %v1716_v42  ;;  %1393 = vmatpush.msrb.mxu3 %v1717_v61  ;;  %v1776_v11 = vld [vmem:[%s3598_s2 + $0x300] sm:$0xff] }
 0x2af   :  { %1334 = vmatpush.msrb.mxu0 %v1718_v50  ;;  %1354 = vmatpush.msrb.mxu1 %v1719_v63  ;;  %v1777_v42 = vld [vmem:[%s3598_s2 + $0x380] sm:$0xff]  ;;  %s1845_s2 = smov [#allocation5]  }
 0x2b0   :  { %1374 = vmatpush.msrb.mxu2 %v1720_v19  ;;  %1394 = vmatpush.msrb.mxu3 %v1721_v21  ;;  %s1456_s22 = sshll.u32 %s1845_s2, 4  ;;  %s1457_s22 = int_to_ptr.vmem [resolvable:$true] %s1456_s22 }
 0x2b1   :  { %1335 = vmatpush.msrb.mxu0 %v1722_v14  ;;  %1355 = vmatpush.msrb.mxu1 %v1723_v22 }
 0x2b2   :  { %1375 = vmatpush.msrb.mxu2 %v1724_v18  ;;  %1395 = vmatpush.msrb.mxu3 %v1725_v23 }
 0x2b3   :  { %1336 = vmatpush.msrb.mxu0 %v1726_v45  ;;  %1356 = vmatpush.msrb.mxu1 %v1727_v52 }
 0x2b4   :  { %1376 = vmatpush.msrb.mxu2 %v1728_v56  ;;  %1396 = vmatpush.msrb.mxu3 %v1729_v53 }
 0x2b5   :  { %1337 = vmatpush.msrb.mxu0 %v1730_v15  ;;  %1357 = vmatpush.msrb.mxu1 %v1731_v16 }
 0x2b6   :  { %1377 = vmatpush.msrb.mxu2 %v1732_v17  ;;  %1397 = vmatpush.msrb.mxu3 %v1733_v20 }
 0x2b7   :  { %1338 = vmatpush.msrb.mxu0 %v1734_v58  ;;  %1358 = vmatpush.msrb.mxu1 %v1735_v57 }
 0x2b8   :  { %1378 = vmatpush.msrb.mxu2 %v1736_v47  ;;  %1398 = vmatpush.msrb.mxu3 %v1737_v9 }
 0x2b9   :  { %1339 = vmatpush.msrb.mxu0 %v1738_v59  ;;  %1359 = vmatpush.msrb.mxu1 %v1739_v40 }
 0x2ba   :  { %1379 = vmatpush.msrb.mxu2 %v1740_v13  ;;  %1399 = vmatpush.msrb.mxu3 %v1741_v62 }
 0x2bb   :  { %1340 = vmatpush.msrb.mxu0 %v1742_v46  ;;  %1360 = vmatpush.msrb.mxu1 %v1743_v60 }
 0x2bc   :  { %1380 = vmatpush.msrb.mxu2 %v1744_v51  ;;  %1400 = vmatpush.msrb.mxu3 %v1745_v43 }
 0x2bd   :  { %1341 = vmatpush.msrb.mxu0 %v1746_v44  ;;  %1361 = vmatpush.msrb.mxu1 %v1747_v54 }
 0x2be   :  { %1381 = vmatpush.msrb.mxu2 %v1748_v24  ;;  %1401 = vmatpush.msrb.mxu3 %v1749_v12 }
 0x2bf   :  { %1342 = vmatpush.msrb.mxu0 %v1750_v25  ;;  %1362 = vmatpush.msrb.mxu1 %v1751_v26 }
 0x2c0   :  { %1382 = vmatpush.msrb.mxu2 %v1752_v27  ;;  %1402 = vmatpush.msrb.mxu3 %v1753_v28 }
 0x2c1   :  { %1343 = vmatpush.msrb.mxu0 %v1754_v29  ;;  %1363 = vmatpush.msrb.mxu1 %v1755_v30 }
 0x2c2   :  { %1383 = vmatpush.msrb.mxu2 %v1756_v31  ;;  %1403 = vmatpush.msrb.mxu3 %v1757_v32 }
 0x2c3   :  { %1344 = vmatpush.msrb.mxu0 %v1758_v33  ;;  %1364 = vmatpush.msrb.mxu1 %v1759_v34 }
 0x2c4   :  { %1384 = vmatpush.msrb.mxu2 %v1760_v35  ;;  %1404 = vmatpush.msrb.mxu3 %v1761_v36 }
 0x2c5   :  { %1345 = vmatpush.msrb.mxu0 %v1762_v37  ;;  %1365 = vmatpush.msrb.mxu1 %v1763_v38 }
 0x2c6   :  { %1385 = vmatpush.msrb.mxu2 %v1764_v39  ;;  %1405 = vmatpush.msrb.mxu3 %v1765_v41 }
 0x2c7   :  { %1346 = vmatpush.msrb.mxu0 %v1766_v0  ;;  %1366 = vmatpush.msrb.mxu1 %v1767_v1 }
 0x2c8   :  { %1386 = vmatpush.msrb.mxu2 %v1768_v2  ;;  %1406 = vmatpush.msrb.mxu3 %v1769_v3 }
 0x2c9   :  { %1347 = vmatpush.msrb.mxu0 %v1770_v4  ;;  %1367 = vmatpush.msrb.mxu1 %v1771_v5 }
 0x2ca   :  { %1387 = vmatpush.msrb.mxu2 %v1772_v6  ;;  %1407 = vmatpush.msrb.mxu3 %v1773_v7 }
 0x2cb   :  { %1348 = vmatpush.msrb.mxu0 %v1774_v8  ;;  %1368 = vmatpush.msrb.mxu1 %v1775_v10 }
 0x2cc   :  { %1388 = vmatpush.msrb.mxu2 %v1776_v11  ;;  %1408 = vmatpush.msrb.mxu3 %v1777_v42 }
 0x306   :  { %v1028_v61 = vpop.f32.mrf.mxu0  ;;  %v1048_v50 = vpop.f32.mrf.mxu1 }
 0x307   :  { %v1171_v63 = vmul.f32 %v1028_v61, %v1028_v61  ;;  %v1172_v19 = vmul.f32 %v1048_v50, %v1048_v50 }
 0x309   :  { %v1179_v21 = vsel %vm378_vm0, %v1171_v63, 0.0  ;;  %v1180_v14 = vsel %vm378_vm0, %v1172_v19, 0.0 }
 0x30a   :  { %v1181_v56 = vadd.f32 %v1180_v14, %v1179_v21 }
 0x30d   :  { %v1068_v22 = vpop.f32.mrf.mxu2  ;;  %v1088_v18 = vpop.f32.mrf.mxu3 }
 0x30e   :  { %v1173_v23 = vmul.f32 %v1068_v22, %v1068_v22  ;;  %v1174_v45 = vmul.f32 %v1088_v18, %v1088_v18  ;;  %v1108_v52 = vpop.f32.mrf.mxu0  ;;  %v1128_v53 = vpop.f32.mrf.mxu1 }
 0x30f   :  { %v1175_v16 = vmul.f32 %v1108_v52, %v1108_v52  ;;  %v1176_v58 = vmul.f32 %v1128_v53, %v1128_v53 }
 0x310   :  { %v1182_v15 = vsel %vm378_vm0, %v1173_v23, 0.0  ;;  %v1184_v20 = vsel %vm378_vm0, %v1174_v45, 0.0  ;;  %v3994_v45 = vld [vmem:[#allocation17_spill] sm:$0xff] }
 0x311   :  { %v1183_v17 = vadd.f32 %v1182_v15, %v1181_v56  ;;  %v1186_v47 = vsel %vm378_vm0, %v1175_v16, 0.0  ;;  %v1188_v13 = vsel %vm378_vm0, %v1176_v58, 0.0 }
 0x313   :  { %v1185_v57 = vadd.f32 %v1184_v20, %v1183_v17 }
 0x315   :  { %v1187_v9 = vadd.f32 %v1186_v47, %v1185_v57  ;;  %v1148_v59 = vpop.f32.mrf.mxu2  ;;  %v1168_v40 = vpop.f32.mrf.mxu3 }
 0x316   :  { %v1177_v62 = vmul.f32 %v1148_v59, %v1148_v59  ;;  %v1178_v46 = vmul.f32 %v1168_v40, %v1168_v40 }
 0x317   :  { %v1189_v60 = vadd.f32 %v1188_v13, %v1187_v9 }
 0x318   :  { %v1190_v51 = vsel %vm378_vm0, %v1177_v62, 0.0  ;;  %v1192_v44 = vsel %vm378_vm0, %v1178_v46, 0.0 }
 0x319   :  { %v1191_v43 = vadd.f32 %v1190_v51, %v1189_v60 }
 0x31b   :  { %v1193_v54 = vadd.f32 %v1192_v44, %v1191_v43 }
 0x31d   :  { %1194 = vadd.xlane.f32.xlu2 %v1193_v54 }
 0x390   :  { %v1195_v24 = vpop.xlane.xlu2 %1194 }
 0x391   :  { %v1196_v12 = vadd.f32 1e-16, %v1195_v24 }
 0x393   :  { %1644 = vrsqrt.f32 %v1196_v12  ;;  %vm1203_vm11 = vweird.f32 %v1196_v12 }
 0x399   :  { %v1645_v25 = vpop.eup %1644 }
 0x39a   :  { %v1198_v26 = vmul.f32 %v1645_v25, %v1196_v12  ;;  %vm1204_vm10 = vweird.f32 %v1645_v25 }
 0x39b   :  { %vm1205_vm12 = vmor %vm1203_vm11, %vm1204_vm10 }
 0x39c   :  { %v1199_v27 = vmul.f32 %v1645_v25, %v1198_v26 }
 0x39e   :  { %v1200_v28 = vmul.f32 0.5, %v1199_v27 }
 0x3a0   :  { %v1201_v29 = vsub.f32 1.5, %v1200_v28 }
 0x3a2   :  { %v1202_v30 = vmul.f32 %v1645_v25, %v1201_v29 }
 0x3a4   :  { %v1206_v31 = vsel %vm1205_vm12, %v1645_v25, %v1202_v30 }
 0x3a5   :  { %v1207_v32 = vmul.f32 %v1206_v31, %v1028_v61  ;;  %v1208_v33 = vmul.f32 %v1206_v31, %v1048_v50  ;;  %v1209_v34 = vmul.f32 %v1206_v31, %v1068_v22  ;;  %v1210_v35 = vmul.f32 %v1206_v31, %v1088_v18  ;;  %v3993_v18 = vld [vmem:[#allocation16_spill] sm:$0xff] }
 0x3a6   :  { %v1211_v36 = vmul.f32 %v1206_v31, %v1108_v52  ;;  %v1212_v37 = vmul.f32 %v1206_v31, %v1128_v53  ;;  %v1213_v38 = vmul.f32 %v1206_v31, %v1148_v59  ;;  %v1214_v39 = vmul.f32 %v1206_v31, %v1168_v40 }
 0x3a7   :  { %1269 = vmatmul.f32.vlgmr.msra.gmra.mxu0 %v1207_v32  ;;  %v1216_v41 = vmul.f32 8.0, %v1208_v33  ;;  %1289 = vmatmul.f32.vlgmr.msra.gmra.mxu1 %v1208_v33  ;;  %v1217_v0 = vmul.f32 8.0, %v1209_v34  ;;  %v1218_v1 = vmul.f32 8.0, %v1210_v35  ;;  %v1215_v5 = vmul.f32 8.0, %v1207_v32 }
 0x3a8   :  { %1309 = vmatmul.f32.vlgmr.msra.gmra.mxu2 %v1209_v34  ;;  %1329 = vmatmul.f32.vlgmr.msra.gmra.mxu3 %v1210_v35  ;;  %v1220_v2 = vmul.f32 8.0, %v1212_v37  ;;  %v1221_v3 = vmul.f32 8.0, %v1213_v38  ;;  %v1222_v4 = vmul.f32 8.0, %v1214_v39  ;;  %v1219_v10 = vmul.f32 8.0, %v1211_v36 }
 0x3a9   :  { %v1231_v6 = vrot.slane %v1216_v41, 6  ;;  %v1232_v7 = vrot.slane %v1217_v0, 4  ;;  %v1233_v8 = vrot.slane %v1218_v1, 2 }
 0x3aa   :  { %v1234_v11 = vrot.slane %v1220_v2, 6  ;;  %v1235_v42 = vrot.slane %v1221_v3, 4  ;;  %v1236_v61 = vrot.slane %v1222_v4, 2 }
 0x3ab   :  { %v1237_v50 = vsel %vm378_vm0, %v1215_v5, %v1231_v6  ;;  %v1239_v63 = vsel %vm1238_vm13, %v1232_v7, %v1233_v8 }
 0x3ac   :  { %v1241_v19 = vsel %vm1240_vm14, %v1237_v50, %v1239_v63  ;;  %v1242_v21 = vsel %vm378_vm0, %v1219_v10, %v1234_v11  ;;  %v1243_v14 = vsel %vm1238_vm13, %v1235_v42, %v1236_v61 }
 0x3ad   :  { %v1244_v22 = vsel %vm1240_vm14, %v1242_v21, %v1243_v14  ;;  %v1249_v23 = vadd.f32 %v1241_v19, %v3993_v18  ;;  %1247 = vst [vmem:[#allocation6] sm:$0xff] %v1241_v19 }
 0x3ae   :  { %v1250_v52 = vadd.f32 %v1244_v22, %v3994_v45  ;;  %1248 = vst [vmem:[#allocation6 + $0x8] sm:$0xff] %v1244_v22 }
 0x3af   :  { %1349 = vmatmul.f32.vlgmr.msrb.gmra.mxu0 %v1211_v36  ;;  %1369 = vmatmul.f32.vlgmr.msrb.gmra.mxu1 %v1212_v37  ;;  %1251 = vst [vmem:[#allocation5] sm:$0xff] %v1249_v23  ;;  %1472 = dma.vmem_to_hbm [thread:$0]  %s1468_s26, 256, %s1470_s29, [#allocation7]  }
 0x3b0   :  { %1389 = vmatmul.f32.vlgmr.msrb.gmra.mxu2 %v1213_v38  ;;  %1409 = vmatmul.f32.vlgmr.msrb.gmra.mxu3 %v1214_v39  ;;  %1252 = vst [vmem:[#allocation5 + $0x8] sm:$0xff] %v1250_v52 }
 0x3b1   :  { %1461 = dma.vmem_to_hbm [thread:$0]  %s1457_s22, 256, %s1459_s0, [#allocation3]  }
 0x424   :  { %v1270_v56 = vpop.f32.mrf.mxu0  ;;  %v1290_v53 = vpop.f32.mrf.mxu1 }
 0x425   :  { %v1291_v15 = vadd.f32 %v1290_v53, %v1270_v56 }
 0x42b   :  { %v1310_v16 = vpop.f32.mrf.mxu2  ;;  %v1330_v17 = vpop.f32.mrf.mxu3 }
 0x42c   :  { %v1311_v20 = vadd.f32 %v1310_v16, %v1291_v15  ;;  %v1350_v57 = vpop.f32.mrf.mxu0  ;;  %v1370_v9 = vpop.f32.mrf.mxu1 }
 0x42e   :  { %v1331_v58 = vadd.f32 %v1330_v17, %v1311_v20 }
 0x430   :  { %v1351_v47 = vadd.f32 %v1350_v57, %v1331_v58 }
 0x432   :  { %v1371_v59 = vadd.f32 %v1370_v9, %v1351_v47 }
 0x433   :  { %v1390_v40 = vpop.f32.mrf.mxu2  ;;  %v1410_v62 = vpop.f32.mrf.mxu3 }
 0x434   :  { %v1391_v13 = vadd.f32 %v1390_v40, %v1371_v59 }
 0x436   :  { %v1411_v46 = vadd.f32 %v1410_v62, %v1391_v13 }
 0x438   :  { %v1413_v60 = vmul.f32 8.0, %v1411_v46 }
 0x43a   :  { %v1414_v51 = vadd.f32 %v1413_v60, %v2842_v48 }
 0x43c   :  { %v1415_v43 = vsel %vm338_vm4, %v1414_v51, -inf }
 0x43d   :  { %1416 = vmax.xlane.f32.xlu0 %v1415_v43 }
 0x4b0   :  { %v1417_v44 = vpop.xlane.xlu0 %1416 }
 0x4b1   :  { %v1418_v54 = vsub.f32 %v1414_v51, %v1417_v44 }
 0x4b3   :  { %v1419_v24 = vmul.f32 1.442695, %v1418_v54 }
 0x4b5   :  { %1646 = vpow2.f32 %v1419_v24 }
 0x4bb   :  { %v1647_v12 = vpop.eup %1646 }
 0x4bc   :  { %v1421_v25 = vsel %vm338_vm4, %v1647_v12, 0.0 }
 0x4bd   :  { %1422 = vadd.xlane.f32.xlu1 %v1421_v25 }
 0x530   :  { %v1423_v26 = vpop.xlane.xlu1 %1422 }
 0x531   :  { %1648 = vlog2.f32 %v1423_v26 }
 0x537   :  { %v1649_v27 = vpop.eup %1648 }
 0x538   :  { %v1425_v28 = vmul.f32 0.6931472, %v1649_v27 }
 0x53a   :  { %v1426_v29 = vsub.f32 %v1418_v54, %v1425_v28 }
 0x53c   :  { %v1427_v30 = vsub.f32 %v3204_v55, %v1426_v29 }
 0x53e   :  { %v1428_v48 = vmul.f32 %v3208_v49, %v1427_v30 }
 0x540   :  { %v1429_v31 = vsel %vm338_vm4, %v1428_v48, 0.0 }
 0x541   :  { %1430 = vadd.xlane.f32.xlu2 %v1429_v31 }
 0x5b4   :  { %v1431_v55 = vpop.xlane.xlu2 %1430 }
 0x5b5   :  { %v1432_v49 = vrot.slane %v1431_v55, 4 }
 0x5b7   :  { %v1433_v32 = vadd.f32 %v1432_v49, %v1431_v55 }
 0x5b9   :  { %v1434_v33 = vrot.slane %v1433_v32, 2 }
 0x5bb   :  { %v1435_v34 = vadd.f32 %v1434_v33, %v1433_v32 }
 0x5bd   :  { %v1436_v35 = vrot.slane %v1435_v34, 1 }
 0x5bf   :  { %v1437_v36 = vadd.f32 %v1436_v35, %v1435_v34 }
 0x5c1   :  { %1625 = vpush %v1437_v36 }
 0x5f2   :  { %s1626_s8 = spop %1625 }
 0x5f3   :  { %s1439_s1 = smul.f32 0.5, %s1626_s8 }
 0x5f5   :  { %1441 = sst [smem:[#allocation2]] %s1439_s1 }
 0x5f6   :  { %1450 = dma.smem_to_hbm %s1847_s9, 16, %s1448_s7, [#allocation4]  }
 0x5f7   :  { %1838 = dma.done.wait [#allocation4], 16  }
 0x5f8   :  { %1839 = vsyncadd [#allocation4], 4294967280 }
 0x5f9   :  { %1840 = dma.done.wait [#allocation3], 256  }
 0x5fa   :  { %1841 = vsyncadd [#allocation3], 4294967040 }
 0x5fb   :  { %1842 = dma.done.wait [#allocation7], 256  }
 0x5fc   :  { %1843 = vsyncadd [#allocation7], 4294967040 }
 0x5fd   :  { %1485 = sfence }
 0x5fe   :  { %1486 = vsyncpa [#allocation3], 1 }
 0x5ff   :  { %1487 = vsyncpa [#allocation7], 1 }
 0x600   :  { %1488 = vsyncpa [#allocation4], 1 }

</bundles_post_ra>
